<compile_context>
chip_gen: v5e
topology: v5e:2x2
jax: 0.10.0
libtpu: 0.0.40
codegen_flags: <defaults>
</compile_context>

<pallas_src>
import functools

import numpy as np
import jax
import jax.numpy as jnp
from jax.experimental import pallas as pl
from jax.experimental.pallas import tpu as pltpu

NUM_FIELDS = 15                      # xa, xb, ya, yb, eps, whole, fp0..fp8
LANES = 128
MAX_SUB = 16

# ---- output-record rows (per parent cell) -----------------------------------
R_VAL, R_LEAF = 0, 1
R_A1, R_A3, R_A4, R_A5, R_A7 = 2, 3, 4, 5, 6      # Q0 new evals
R_B1, R_B4, R_B5, R_B7 = 7, 8, 9, 10              # Q1 new evals (A5 shared)
R_C3, R_C4, R_C5, R_C7 = 11, 12, 13, 14           # Q2 new evals (A7 shared)
R_D4, R_D5, R_D7 = 15, 16, 17                     # Q3 new evals (B7, C5 shared)
R_R0, R_R1, R_R2 = 18, 19, 20                     # quadrant integrals (child wholes)
NUM_OUT = 21


def _bucket_groups(n_cells):
    """Lane-group count for a worklist of n_cells (>= 1)."""
    g = max(1, -(-n_cells // LANES))
    if g <= 8:
        return 1 << (g - 1).bit_length()           # 1, 2, 4, 8
    # ~1.5x growth ladder on multiples of 8 groups: bounded padding waste
    # (<~33%) with a bounded number of distinct compiled shapes.
    b = 8
    while b < g:
        b = -(-max(b + 8, (b * 3) // 2) // 8) * 8
    return b


def _choose_tiling(groups):
    """(sub, grid): (8,128)-legal blocks; grid >= 2 once groups > 8 (v7x TCs)."""
    if groups <= 8:
        return groups, 1
    if groups % MAX_SUB == 0 and groups // MAX_SUB >= 2:
        return MAX_SUB, groups // MAX_SUB
    return 8, groups // 8


def _make_step_kernel(method, hmin):
    hmin = float(hmin)
    inv15 = 1.0 / 15.0
    inv48 = 1.0 / 48.0

    def kernel(cells_ref, out_ref):
        xa = cells_ref[0]
        xb = cells_ref[1]
        ya = cells_ref[2]
        yb = cells_ref[3]
        eps = cells_ref[4]
        whole = cells_ref[5]

        mx = (xa + xb) * 0.5
        my = (ya + yb) * 0.5
        xq1 = (xa + mx) * 0.5          # quarter points
        xq3 = (mx + xb) * 0.5
        yq1 = (ya + my) * 0.5
        yq3 = (my + yb) * 0.5
        hx = xb - xa
        hy = yb - ya
        # Hoisted common area factor: every quadrant is (hx/2)*(hy/2)/12.
        scale = hx * hy * inv48

        # 16 unique integrand evaluations per cell (shared quadrant edges
        # deduplicated from the reference's 20; math identical).  Each value is
        # stored exactly once; parent-copy fp corners are NOT re-stored.

        # ---- quadrant 0: [xa, mx] x [ya, my] --------------------------------
        a1 = method(xq1, ya)
        a3 = method(xa, yq1)
        a5 = method(mx, yq1)           # shared edge with Q1 (its f3)
        a7 = method(xq1, my)           # shared edge with Q2 (its f1)
        out_ref[R_A1, :, :] = a1
        out_ref[R_A3, :, :] = a3
        out_ref[R_A5, :, :] = a5
        out_ref[R_A7, :, :] = a7
        out_ref[R_A4, :, :] = method(xq1, yq1)   # center: for children only
        r0 = scale * (4.0 * (a1 + a3 + a5 + a7)
                      - (cells_ref[6] + cells_ref[7] + cells_ref[9] + cells_ref[10]))
        out_ref[R_R0, :, :] = r0

        # ---- quadrant 1: [mx, xb] x [ya, my] --------------------------------
        b1 = method(xq3, ya)
        b5 = method(xb, yq1)
        b7 = method(xq3, my)           # shared edge with Q3 (its f1)
        out_ref[R_B1, :, :] = b1
        out_ref[R_B5, :, :] = b5
        out_ref[R_B7, :, :] = b7
        out_ref[R_B4, :, :] = method(xq3, yq1)
        r1 = scale * (4.0 * (b1 + a5 + b5 + b7)
                      - (cells_ref[7] + cells_ref[8] + cells_ref[10] + cells_ref[11]))
        out_ref[R_R1, :, :] = r1

        # ---- quadrant 2: [xa, mx] x [my, yb] --------------------------------
        c3 = method(xa, yq3)
        c5 = method(mx, yq3)           # shared edge with Q3 (its f3)
        c7 = method(xq1, yb)
        out_ref[R_C3, :, :] = c3
        out_ref[R_C5, :, :] = c5
        out_ref[R_C7, :, :] = c7
        out_ref[R_C4, :, :] = method(xq1, yq3)
        r2 = scale * (4.0 * (a7 + c3 + c5 + c7)
                      - (cells_ref[9] + cells_ref[10] + cells_ref[12] + cells_ref[13]))
        out_ref[R_R2, :, :] = r2

        # ---- quadrant 3: [mx, xb] x [my, yb] --------------------------------
        d5 = method(xb, yq3)
        d7 = method(xq3, yb)
        out_ref[R_D5, :, :] = d5
        out_ref[R_D7, :, :] = d7
        out_ref[R_D4, :, :] = method(xq3, yq3)
        r3 = scale * (4.0 * (b7 + c5 + d5 + d7)
                      - (cells_ref[10] + cells_ref[11] + cells_ref[13] + cells_ref[14]))

        # ---- leaf / refine decision ----------------------------------------
        sum_q = r0 + r1 + r2 + r3
        delta = sum_q - whole
        # min(|xq0[1]-xq0[0]|, |yq0[3]-yq0[0]|) == min(|hx|,|hy|)/4 of parent.
        too_small = jnp.minimum(jnp.abs(hx), jnp.abs(hy)) * 0.25 < hmin
        is_leaf = (jnp.abs(delta) <= 15.0 * eps) | too_small
        out_ref[R_VAL, :, :] = sum_q + delta * inv15     # leaf value
        out_ref[R_LEAF, :, :] = is_leaf.astype(jnp.float32)

    return kernel


@functools.lru_cache(maxsize=None)
def _build_step(method, hmin, groups):
    sub, grid = _choose_tiling(groups)
    kernel = _make_step_kernel(method, hmin)
    return pl.pallas_call(
        kernel,
        out_shape=jax.ShapeDtypeStruct((NUM_OUT, groups, LANES), jnp.float32),
        grid=(grid,),
        in_specs=[pl.BlockSpec((NUM_FIELDS, sub, LANES), lambda i: (0, i, 0))],
        out_specs=pl.BlockSpec((NUM_OUT, sub, LANES), lambda i: (0, i, 0)),
        compiler_params=pltpu.CompilerParams(
            dimension_semantics=("parallel",)),
    )


def _analyze(out_flat, valid):
    leaf = (out_flat[R_LEAF] > 0.5) & valid
    active = valid & ~leaf
    leaf_sum = jnp.sum(jnp.where(leaf, out_flat[R_VAL], 0.0))
    all_sum = jnp.sum(jnp.where(valid, out_flat[R_VAL], 0.0))
    k = jnp.sum(active.astype(jnp.int32))
    return leaf_sum, all_sum, k, active


@functools.lru_cache(maxsize=None)
def _build_level0(method, hmin, groups):
    """Level 0: pallas step on the (replicated) root + leaf/active reduction."""
    npad = groups * LANES
    step = _build_step(method, hmin, groups)

    @jax.jit
    def run(cells):
        out = step(cells)
        valid = jnp.arange(npad, dtype=jnp.int32) < 1      # only the root lane
        leaf_sum, all_sum, k, active = _analyze(out.reshape(NUM_OUT, npad), valid)
        return cells, out, active, leaf_sum, all_sum, k

    return run


@functools.lru_cache(maxsize=None)
def _build_level(method, hmin, groups_in, groups_out):
    """One fused dispatch: compaction+child assembly -> pallas step -> reduce."""
    npad_in = groups_in * LANES
    npad_out = groups_out * LANES
    kcap = npad_out // 4                 # child slots per quadrant block
    step = _build_step(method, hmin, groups_out)

    @jax.jit
    def run(out_prev, cells_prev, active_prev):
        # ---- compaction + child assembly (quadrant-major, lane dim minor) ---
        k_par = jnp.sum(active_prev.astype(jnp.int32))
        flat_out = out_prev.reshape(NUM_OUT, npad_in)
        flat_cells = cells_prev.reshape(NUM_FIELDS, npad_in)
        # Surviving parent columns; fills point at column 0 (a real cell, so
        # duplicates are numerically benign and masked out of the sums below).
        # TODO(synk): for very large levels this lane-dim XLA gather could be
        # replaced by a Pallas scalar-prefetch DMA gather / one-hot MXU matmul.
        idx = jnp.nonzero(active_prev, size=kcap, fill_value=0)[0]

        par = jnp.take(flat_cells, idx, axis=1)            # (15, kcap)
        ev = jnp.take(flat_out[2:], idx, axis=1)           # (19, kcap)
        e = lambda r: ev[r - 2]

        xa, xb, ya, yb, eps = par[0], par[1], par[2], par[3], par[4]
        p = [par[6 + i] for i in range(9)]
        mx = (xa + xb) * 0.5
        my = (ya + yb) * 0.5
        eps4 = eps * 0.25
        r0, r1, r2 = e(R_R0), e(R_R1), e(R_R2)

        q0 = [xa, mx, ya, my, eps4, r0,
              p[0], e(R_A1), p[1], e(R_A3), e(R_A4), e(R_A5), p[3], e(R_A7), p[4]]
        q1 = [mx, xb, ya, my, eps4, r1,
              p[1], e(R_B1), p[2], e(R_A5), e(R_B4), e(R_B5), p[4], e(R_B7), p[5]]
        q2 = [xa, mx, my, yb, eps4, r2,
              p[3], e(R_A7), p[4], e(R_C3), e(R_C4), e(R_C5), p[6], e(R_C7), p[7]]
        # Reference quirk reproduced deliberately: quadrant 3's children get
        # q0 (not q3) as `whole` (see `_quad2D_asr(..., eps/4.0, q0)`).
        q3 = [mx, xb, my, yb, eps4, r0,
              p[4], e(R_B7), p[5], e(R_C5), e(R_D4), e(R_D5), p[7], e(R_D7), p[8]]

        # (15, 4, kcap): only major-axis stacks, lane dim stays minor -> no
        # minor-dim relayout.  Flatten -> column = q*kcap + c (quadrant-major).
        kids = jnp.stack([jnp.stack(q0), jnp.stack(q1),
                          jnp.stack(q2), jnp.stack(q3)], axis=1)
        cells = kids.reshape(NUM_FIELDS, npad_out).reshape(
            NUM_FIELDS, groups_out, LANES)

        # ---- Pallas step + leaf/active reduction (same dispatch) ------------
        out = step(cells)
        col = jnp.arange(npad_out, dtype=jnp.int32)
        valid = (col % kcap) < k_par                       # quadrant-major validity
        leaf_sum, all_sum, k, active = _analyze(out.reshape(NUM_OUT, npad_out), valid)
        return cells, out, active, leaf_sum, all_sum, k

    return run


def simpsons2d_forward(method, xa, xb, ya, yb, eps,
                       fcount_out=True, fcount_max=None, hmin=None,
                       max_levels=24):
    """Matches Simpsons2D.forward(method, xa, xb, ya, yb, eps)."""
    xa, xb, ya, yb, eps = map(float, (xa, xb, ya, yb, eps))
    if hmin is None:
        hmin = min(abs(xb - xa), yb - ya) * 1e-6   # reference quirk kept verbatim
    hmin = float(hmin)
    if fcount_max is None:
        fcount_max = float('inf')

    # Root setup (_simps2D_adaptive + first _quad_simpsons2D_mem): 9 evals.
    mx, my = (xa + xb) / 2.0, (ya + yb) / 2.0
    xs = jnp.asarray([xa, mx, xb, xa, mx, xb, xa, mx, xb], jnp.float32)
    ys = jnp.asarray([ya, ya, ya, my, my, my, yb, yb, yb], jnp.float32)
    fp0 = np.asarray(method(xs, ys), np.float32)
    fcount = 9
    hx, hy = xb - xa, yb - ya
    whole = hx * hy / 12.0 * (-fp0[0] + 4 * fp0[1] - fp0[2] + 4 * fp0[3]
                              + 4 * fp0[5] - fp0[6] + 4 * fp0[7] - fp0[8])

    groups = _bucket_groups(1)
    npad = groups * LANES
    root = np.concatenate(
        [np.asarray([xa, xb, ya, yb, eps, whole], np.float32), fp0])
    # Pad by replicating the root cell so padded lanes stay numerically benign.
    cells = jnp.tile(jnp.asarray(root, jnp.float32)[:, None], (1, npad))
    cells = cells.reshape(NUM_FIELDS, groups, LANES)

    total = 0.0
    n = 1                      # valid cells processed by the next level
    out = active = None
    groups_prev = groups
    # TODO(synk): fuse the first few levels (worklist <= ~2048 cells) into one
    # on-device lax.while_loop to also remove the per-level host sync.
    for level in range(max_levels):
        # Keep reference accounting: 4 quadrants x 5 evals per processed cell
        # = 20 (the kernel dedups shared edges to 16 unique evals, math same).
        fcount += 20 * n

        if level == 0:
            state = _build_level0(method, hmin, groups)(cells)
        else:
            state = _build_level(method, hmin, groups_prev, groups)(
                out, cells, active)
        cells, out, active, leaf_sum, all_sum, k = state   # stays on device

        if fcount > fcount_max:
            # TODO(synk): reference checks fcount_max per node in DFS order;
            # this BFS approximation treats the whole level as leaves
            # (exact for the default fcount_max=inf).
            total += float(jax.device_get(all_sum))
            break

        k_host, ls = jax.device_get((k, leaf_sum))         # 2 scalars / level
        total += float(ls)
        k_host = int(k_host)
        if k_host == 0:
            break

        n = 4 * k_host
        groups_prev = groups
        groups = _bucket_groups(n)

    result = jnp.asarray(total, dtype=jnp.float32)
    if fcount_out:
        return result, fcount
    return result


if __name__ == "__main__":
    def method(x, y):
        return jnp.sin(x) * jnp.cos(y)

    key = jax.random.PRNGKey(0)
    jit_off = jax.random.uniform(key, (2,), minval=0.0, maxval=0.1)
    xa, xb = 0.0, 2.0 + float(jit_off[0])
    ya, yb = 0.0, 1.5 + float(jit_off[1])
    eps = 1e-4

    result, fcount = simpsons2d_forward(method, xa, xb, ya, yb, eps,
                                        fcount_out=True)
    result = jax.block_until_ready(result)

    expected = (1.0 - np.cos(xb)) * np.sin(yb)   # analytic ∫∫ sin(x)cos(y)
    assert np.isfinite(float(result)) and fcount >= 9
    assert abs(float(result) - expected) < 1e-2, (float(result), expected, fcount)
    print("KERNEL_OK")
</pallas_src>

<mosaic_0001>
module attributes {stable_mosaic.version = 11 : i64} {
  func.func @kernel(%arg0: i32, %arg1: memref<15x1x128xf32, #tpu.memory_space<vmem>>, %arg2: memref<21x1x128xf32, #tpu.memory_space<vmem>>) attributes {dimension_semantics = [#tpu.dimension_semantics<parallel>], iteration_bounds = array<i64: 1>, scalar_prefetch = 0 : i64, scratch_operands = 0 : i64, tpu.core_type = #tpu.core_type<tc>, window_params = [{transform_indices = @transform_0, window_bounds = array<i64: 15, 1, 128>}, {transform_indices = @transform_1, window_bounds = array<i64: 21, 1, 128>}]} {
    %c0 = arith.constant 0 : index
    %c0_0 = arith.constant 0 : index
    %c0_1 = arith.constant 0 : index
    %0 = vector.load %arg1[%c0, %c0_0, %c0_1] : memref<15x1x128xf32, #tpu.memory_space<vmem>>, vector<1x1x128xf32>
    %1 = vector.shape_cast %0 : vector<1x1x128xf32> to vector<1x128xf32>
    %c1 = arith.constant 1 : index
    %c0_2 = arith.constant 0 : index
    %c0_3 = arith.constant 0 : index
    %2 = vector.load %arg1[%c1, %c0_2, %c0_3] : memref<15x1x128xf32, #tpu.memory_space<vmem>>, vector<1x1x128xf32>
    %3 = vector.shape_cast %2 : vector<1x1x128xf32> to vector<1x128xf32>
    %c2 = arith.constant 2 : index
    %c0_4 = arith.constant 0 : index
    %c0_5 = arith.constant 0 : index
    %4 = vector.load %arg1[%c2, %c0_4, %c0_5] : memref<15x1x128xf32, #tpu.memory_space<vmem>>, vector<1x1x128xf32>
    %5 = vector.shape_cast %4 : vector<1x1x128xf32> to vector<1x128xf32>
    %c3 = arith.constant 3 : index
    %c0_6 = arith.constant 0 : index
    %c0_7 = arith.constant 0 : index
    %6 = vector.load %arg1[%c3, %c0_6, %c0_7] : memref<15x1x128xf32, #tpu.memory_space<vmem>>, vector<1x1x128xf32>
    %7 = vector.shape_cast %6 : vector<1x1x128xf32> to vector<1x128xf32>
    %c4 = arith.constant 4 : index
    %c0_8 = arith.constant 0 : index
    %c0_9 = arith.constant 0 : index
    %8 = vector.load %arg1[%c4, %c0_8, %c0_9] : memref<15x1x128xf32, #tpu.memory_space<vmem>>, vector<1x1x128xf32>
    %9 = vector.shape_cast %8 : vector<1x1x128xf32> to vector<1x128xf32>
    %c5 = arith.constant 5 : index
    %c0_10 = arith.constant 0 : index
    %c0_11 = arith.constant 0 : index
    %10 = vector.load %arg1[%c5, %c0_10, %c0_11] : memref<15x1x128xf32, #tpu.memory_space<vmem>>, vector<1x1x128xf32>
    %11 = vector.shape_cast %10 : vector<1x1x128xf32> to vector<1x128xf32>
    %12 = arith.addf %1, %3 : vector<1x128xf32>
    %cst = arith.constant 5.000000e-01 : f32
    %13 = vector.broadcast %cst : f32 to vector<1x128xf32>
    %14 = arith.mulf %12, %13 : vector<1x128xf32>
    %15 = arith.addf %5, %7 : vector<1x128xf32>
    %cst_12 = arith.constant 5.000000e-01 : f32
    %16 = vector.broadcast %cst_12 : f32 to vector<1x128xf32>
    %17 = arith.mulf %15, %16 : vector<1x128xf32>
    %18 = arith.addf %1, %14 : vector<1x128xf32>
    %cst_13 = arith.constant 5.000000e-01 : f32
    %19 = vector.broadcast %cst_13 : f32 to vector<1x128xf32>
    %20 = arith.mulf %18, %19 : vector<1x128xf32>
    %21 = arith.addf %14, %3 : vector<1x128xf32>
    %cst_14 = arith.constant 5.000000e-01 : f32
    %22 = vector.broadcast %cst_14 : f32 to vector<1x128xf32>
    %23 = arith.mulf %21, %22 : vector<1x128xf32>
    %24 = arith.addf %5, %17 : vector<1x128xf32>
    %cst_15 = arith.constant 5.000000e-01 : f32
    %25 = vector.broadcast %cst_15 : f32 to vector<1x128xf32>
    %26 = arith.mulf %24, %25 : vector<1x128xf32>
    %27 = arith.addf %17, %7 : vector<1x128xf32>
    %cst_16 = arith.constant 5.000000e-01 : f32
    %28 = vector.broadcast %cst_16 : f32 to vector<1x128xf32>
    %29 = arith.mulf %27, %28 : vector<1x128xf32>
    %30 = arith.subf %3, %1 : vector<1x128xf32>
    %31 = arith.subf %7, %5 : vector<1x128xf32>
    %32 = arith.mulf %30, %31 : vector<1x128xf32>
    %cst_17 = arith.constant 0.020833334 : f32
    %33 = vector.broadcast %cst_17 : f32 to vector<1x128xf32>
    %34 = arith.mulf %32, %33 : vector<1x128xf32>
    %35 = math.sin %20 : vector<1x128xf32>
    %36 = math.cos %5 : vector<1x128xf32>
    %37 = arith.mulf %35, %36 : vector<1x128xf32>
    %38 = math.sin %1 : vector<1x128xf32>
    %39 = math.cos %26 : vector<1x128xf32>
    %40 = arith.mulf %38, %39 : vector<1x128xf32>
    %41 = math.sin %14 : vector<1x128xf32>
    %42 = math.cos %26 : vector<1x128xf32>
    %43 = arith.mulf %41, %42 : vector<1x128xf32>
    %44 = math.sin %20 : vector<1x128xf32>
    %45 = math.cos %17 : vector<1x128xf32>
    %46 = arith.mulf %44, %45 : vector<1x128xf32>
    %c2_18 = arith.constant 2 : index
    %c0_19 = arith.constant 0 : index
    %c0_20 = arith.constant 0 : index
    %47 = vector.load %arg2[%c2_18, %c0_19, %c0_20] : memref<21x1x128xf32, #tpu.memory_space<vmem>>, vector<1x1x128xf32>
    %48 = vector.shape_cast %47 : vector<1x1x128xf32> to vector<1x128xf32>
    %49 = vector.shape_cast %37 : vector<1x128xf32> to vector<1x1x128xf32>
    tpu.vector_store %arg2[%c2_18, %c0_19, %c0_20], %49 {strides = array<i32>} : memref<21x1x128xf32, #tpu.memory_space<vmem>>, vector<1x1x128xf32>,
    %c3_21 = arith.constant 3 : index
    %c0_22 = arith.constant 0 : index
    %c0_23 = arith.constant 0 : index
    %50 = vector.load %arg2[%c3_21, %c0_22, %c0_23] : memref<21x1x128xf32, #tpu.memory_space<vmem>>, vector<1x1x128xf32>
    %51 = vector.shape_cast %50 : vector<1x1x128xf32> to vector<1x128xf32>
    %52 = vector.shape_cast %40 : vector<1x128xf32> to vector<1x1x128xf32>
    tpu.vector_store %arg2[%c3_21, %c0_22, %c0_23], %52 {strides = array<i32>} : memref<21x1x128xf32, #tpu.memory_space<vmem>>, vector<1x1x128xf32>,
    %c5_24 = arith.constant 5 : index
    %c0_25 = arith.constant 0 : index
    %c0_26 = arith.constant 0 : index
    %53 = vector.load %arg2[%c5_24, %c0_25, %c0_26] : memref<21x1x128xf32, #tpu.memory_space<vmem>>, vector<1x1x128xf32>
    %54 = vector.shape_cast %53 : vector<1x1x128xf32> to vector<1x128xf32>
    %55 = vector.shape_cast %43 : vector<1x128xf32> to vector<1x1x128xf32>
    tpu.vector_store %arg2[%c5_24, %c0_25, %c0_26], %55 {strides = array<i32>} : memref<21x1x128xf32, #tpu.memory_space<vmem>>, vector<1x1x128xf32>,
    %c6 = arith.constant 6 : index
    %c0_27 = arith.constant 0 : index
    %c0_28 = arith.constant 0 : index
    %56 = vector.load %arg2[%c6, %c0_27, %c0_28] : memref<21x1x128xf32, #tpu.memory_space<vmem>>, vector<1x1x128xf32>
    %57 = vector.shape_cast %56 : vector<1x1x128xf32> to vector<1x128xf32>
    %58 = vector.shape_cast %46 : vector<1x128xf32> to vector<1x1x128xf32>
    tpu.vector_store %arg2[%c6, %c0_27, %c0_28], %58 {strides = array<i32>} : memref<21x1x128xf32, #tpu.memory_space<vmem>>, vector<1x1x128xf32>,
    %59 = math.sin %20 : vector<1x128xf32>
    %60 = math.cos %26 : vector<1x128xf32>
    %61 = arith.mulf %59, %60 : vector<1x128xf32>
    %c4_29 = arith.constant 4 : index
    %c0_30 = arith.constant 0 : index
    %c0_31 = arith.constant 0 : index
    %62 = vector.load %arg2[%c4_29, %c0_30, %c0_31] : memref<21x1x128xf32, #tpu.memory_space<vmem>>, vector<1x1x128xf32>
    %63 = vector.shape_cast %62 : vector<1x1x128xf32> to vector<1x128xf32>
    %64 = vector.shape_cast %61 : vector<1x128xf32> to vector<1x1x128xf32>
    tpu.vector_store %arg2[%c4_29, %c0_30, %c0_31], %64 {strides = array<i32>} : memref<21x1x128xf32, #tpu.memory_space<vmem>>, vector<1x1x128xf32>,
    %65 = arith.addf %37, %40 : vector<1x128xf32>
    %66 = arith.addf %65, %43 : vector<1x128xf32>
    %67 = arith.addf %66, %46 : vector<1x128xf32>
    %cst_32 = arith.constant 4.000000e+00 : f32
    %68 = vector.broadcast %cst_32 : f32 to vector<1x128xf32>
    %69 = arith.mulf %68, %67 : vector<1x128xf32>
    %c6_33 = arith.constant 6 : index
    %c0_34 = arith.constant 0 : index
    %c0_35 = arith.constant 0 : index
    %70 = vector.load %arg1[%c6_33, %c0_34, %c0_35] : memref<15x1x128xf32, #tpu.memory_space<vmem>>, vector<1x1x128xf32>
    %71 = vector.shape_cast %70 : vector<1x1x128xf32> to vector<1x128xf32>
    %c7 = arith.constant 7 : index
    %c0_36 = arith.constant 0 : index
    %c0_37 = arith.constant 0 : index
    %72 = vector.load %arg1[%c7, %c0_36, %c0_37] : memref<15x1x128xf32, #tpu.memory_space<vmem>>, vector<1x1x128xf32>
    %73 = vector.shape_cast %72 : vector<1x1x128xf32> to vector<1x128xf32>
    %74 = arith.addf %71, %73 : vector<1x128xf32>
    %c9 = arith.constant 9 : index
    %c0_38 = arith.constant 0 : index
    %c0_39 = arith.constant 0 : index
    %75 = vector.load %arg1[%c9, %c0_38, %c0_39] : memref<15x1x128xf32, #tpu.memory_space<vmem>>, vector<1x1x128xf32>
    %76 = vector.shape_cast %75 : vector<1x1x128xf32> to vector<1x128xf32>
    %77 = arith.addf %74, %76 : vector<1x128xf32>
    %c10 = arith.constant 10 : index
    %c0_40 = arith.constant 0 : index
    %c0_41 = arith.constant 0 : index
    %78 = vector.load %arg1[%c10, %c0_40, %c0_41] : memref<15x1x128xf32, #tpu.memory_space<vmem>>, vector<1x1x128xf32>
    %79 = vector.shape_cast %78 : vector<1x1x128xf32> to vector<1x128xf32>
    %80 = arith.addf %77, %79 : vector<1x128xf32>
    %81 = arith.subf %69, %80 : vector<1x128xf32>
    %82 = arith.mulf %34, %81 : vector<1x128xf32>
    %c18 = arith.constant 18 : index
    %c0_42 = arith.constant 0 : index
    %c0_43 = arith.constant 0 : index
    %83 = vector.load %arg2[%c18, %c0_42, %c0_43] : memref<21x1x128xf32, #tpu.memory_space<vmem>>, vector<1x1x128xf32>
    %84 = vector.shape_cast %83 : vector<1x1x128xf32> to vector<1x128xf32>
    %85 = vector.shape_cast %82 : vector<1x128xf32> to vector<1x1x128xf32>
    tpu.vector_store %arg2[%c18, %c0_42, %c0_43], %85 {strides = array<i32>} : memref<21x1x128xf32, #tpu.memory_space<vmem>>, vector<1x1x128xf32>,
    %86 = math.sin %23 : vector<1x128xf32>
    %87 = math.cos %5 : vector<1x128xf32>
    %88 = arith.mulf %86, %87 : vector<1x128xf32>
    %89 = math.sin %3 : vector<1x128xf32>
    %90 = math.cos %26 : vector<1x128xf32>
    %91 = arith.mulf %89, %90 : vector<1x128xf32>
    %92 = math.sin %23 : vector<1x128xf32>
    %93 = math.cos %17 : vector<1x128xf32>
    %94 = arith.mulf %92, %93 : vector<1x128xf32>
    %c7_44 = arith.constant 7 : index
    %c0_45 = arith.constant 0 : index
    %c0_46 = arith.constant 0 : index
    %95 = vector.load %arg2[%c7_44, %c0_45, %c0_46] : memref<21x1x128xf32, #tpu.memory_space<vmem>>, vector<1x1x128xf32>
    %96 = vector.shape_cast %95 : vector<1x1x128xf32> to vector<1x128xf32>
    %97 = vector.shape_cast %88 : vector<1x128xf32> to vector<1x1x128xf32>
    tpu.vector_store %arg2[%c7_44, %c0_45, %c0_46], %97 {strides = array<i32>} : memref<21x1x128xf32, #tpu.memory_space<vmem>>, vector<1x1x128xf32>,
    %c9_47 = arith.constant 9 : index
    %c0_48 = arith.constant 0 : index
    %c0_49 = arith.constant 0 : index
    %98 = vector.load %arg2[%c9_47, %c0_48, %c0_49] : memref<21x1x128xf32, #tpu.memory_space<vmem>>, vector<1x1x128xf32>
    %99 = vector.shape_cast %98 : vector<1x1x128xf32> to vector<1x128xf32>
    %100 = vector.shape_cast %91 : vector<1x128xf32> to vector<1x1x128xf32>
    tpu.vector_store %arg2[%c9_47, %c0_48, %c0_49], %100 {strides = array<i32>} : memref<21x1x128xf32, #tpu.memory_space<vmem>>, vector<1x1x128xf32>,
    %c10_50 = arith.constant 10 : index
    %c0_51 = arith.constant 0 : index
    %c0_52 = arith.constant 0 : index
    %101 = vector.load %arg2[%c10_50, %c0_51, %c0_52] : memref<21x1x128xf32, #tpu.memory_space<vmem>>, vector<1x1x128xf32>
    %102 = vector.shape_cast %101 : vector<1x1x128xf32> to vector<1x128xf32>
    %103 = vector.shape_cast %94 : vector<1x128xf32> to vector<1x1x128xf32>
    tpu.vector_store %arg2[%c10_50, %c0_51, %c0_52], %103 {strides = array<i32>} : memref<21x1x128xf32, #tpu.memory_space<vmem>>, vector<1x1x128xf32>,
    %104 = math.sin %23 : vector<1x128xf32>
    %105 = math.cos %26 : vector<1x128xf32>
    %106 = arith.mulf %104, %105 : vector<1x128xf32>
    %c8 = arith.constant 8 : index
    %c0_53 = arith.constant 0 : index
    %c0_54 = arith.constant 0 : index
    %107 = vector.load %arg2[%c8, %c0_53, %c0_54] : memref<21x1x128xf32, #tpu.memory_space<vmem>>, vector<1x1x128xf32>
    %108 = vector.shape_cast %107 : vector<1x1x128xf32> to vector<1x128xf32>
    %109 = vector.shape_cast %106 : vector<1x128xf32> to vector<1x1x128xf32>
    tpu.vector_store %arg2[%c8, %c0_53, %c0_54], %109 {strides = array<i32>} : memref<21x1x128xf32, #tpu.memory_space<vmem>>, vector<1x1x128xf32>,
    %110 = arith.addf %88, %43 : vector<1x128xf32>
    %111 = arith.addf %110, %91 : vector<1x128xf32>
    %112 = arith.addf %111, %94 : vector<1x128xf32>
    %cst_55 = arith.constant 4.000000e+00 : f32
    %113 = vector.broadcast %cst_55 : f32 to vector<1x128xf32>
    %114 = arith.mulf %113, %112 : vector<1x128xf32>
    %c7_56 = arith.constant 7 : index
    %c0_57 = arith.constant 0 : index
    %c0_58 = arith.constant 0 : index
    %115 = vector.load %arg1[%c7_56, %c0_57, %c0_58] : memref<15x1x128xf32, #tpu.memory_space<vmem>>, vector<1x1x128xf32>
    %116 = vector.shape_cast %115 : vector<1x1x128xf32> to vector<1x128xf32>
    %c8_59 = arith.constant 8 : index
    %c0_60 = arith.constant 0 : index
    %c0_61 = arith.constant 0 : index
    %117 = vector.load %arg1[%c8_59, %c0_60, %c0_61] : memref<15x1x128xf32, #tpu.memory_space<vmem>>, vector<1x1x128xf32>
    %118 = vector.shape_cast %117 : vector<1x1x128xf32> to vector<1x128xf32>
    %119 = arith.addf %116, %118 : vector<1x128xf32>
    %c10_62 = arith.constant 10 : index
    %c0_63 = arith.constant 0 : index
    %c0_64 = arith.constant 0 : index
    %120 = vector.load %arg1[%c10_62, %c0_63, %c0_64] : memref<15x1x128xf32, #tpu.memory_space<vmem>>, vector<1x1x128xf32>
    %121 = vector.shape_cast %120 : vector<1x1x128xf32> to vector<1x128xf32>
    %122 = arith.addf %119, %121 : vector<1x128xf32>
    %c11 = arith.constant 11 : index
    %c0_65 = arith.constant 0 : index
    %c0_66 = arith.constant 0 : index
    %123 = vector.load %arg1[%c11, %c0_65, %c0_66] : memref<15x1x128xf32, #tpu.memory_space<vmem>>, vector<1x1x128xf32>
    %124 = vector.shape_cast %123 : vector<1x1x128xf32> to vector<1x128xf32>
    %125 = arith.addf %122, %124 : vector<1x128xf32>
    %126 = arith.subf %114, %125 : vector<1x128xf32>
    %127 = arith.mulf %34, %126 : vector<1x128xf32>
    %c19 = arith.constant 19 : index
    %c0_67 = arith.constant 0 : index
    %c0_68 = arith.constant 0 : index
    %128 = vector.load %arg2[%c19, %c0_67, %c0_68] : memref<21x1x128xf32, #tpu.memory_space<vmem>>, vector<1x1x128xf32>
    %129 = vector.shape_cast %128 : vector<1x1x128xf32> to vector<1x128xf32>
    %130 = vector.shape_cast %127 : vector<1x128xf32> to vector<1x1x128xf32>
    tpu.vector_store %arg2[%c19, %c0_67, %c0_68], %130 {strides = array<i32>} : memref<21x1x128xf32, #tpu.memory_space<vmem>>, vector<1x1x128xf32>,
    %131 = math.sin %1 : vector<1x128xf32>
    %132 = math.cos %29 : vector<1x128xf32>
    %133 = arith.mulf %131, %132 : vector<1x128xf32>
    %134 = math.sin %14 : vector<1x128xf32>
    %135 = math.cos %29 : vector<1x128xf32>
    %136 = arith.mulf %134, %135 : vector<1x128xf32>
    %137 = math.sin %20 : vector<1x128xf32>
    %138 = math.cos %7 : vector<1x128xf32>
    %139 = arith.mulf %137, %138 : vector<1x128xf32>
    %c11_69 = arith.constant 11 : index
    %c0_70 = arith.constant 0 : index
    %c0_71 = arith.constant 0 : index
    %140 = vector.load %arg2[%c11_69, %c0_70, %c0_71] : memref<21x1x128xf32, #tpu.memory_space<vmem>>, vector<1x1x128xf32>
    %141 = vector.shape_cast %140 : vector<1x1x128xf32> to vector<1x128xf32>
    %142 = vector.shape_cast %133 : vector<1x128xf32> to vector<1x1x128xf32>
    tpu.vector_store %arg2[%c11_69, %c0_70, %c0_71], %142 {strides = array<i32>} : memref<21x1x128xf32, #tpu.memory_space<vmem>>, vector<1x1x128xf32>,
    %c13 = arith.constant 13 : index
    %c0_72 = arith.constant 0 : index
    %c0_73 = arith.constant 0 : index
    %143 = vector.load %arg2[%c13, %c0_72, %c0_73] : memref<21x1x128xf32, #tpu.memory_space<vmem>>, vector<1x1x128xf32>
    %144 = vector.shape_cast %143 : vector<1x1x128xf32> to vector<1x128xf32>
    %145 = vector.shape_cast %136 : vector<1x128xf32> to vector<1x1x128xf32>
    tpu.vector_store %arg2[%c13, %c0_72, %c0_73], %145 {strides = array<i32>} : memref<21x1x128xf32, #tpu.memory_space<vmem>>, vector<1x1x128xf32>,
    %c14 = arith.constant 14 : index
    %c0_74 = arith.constant 0 : index
    %c0_75 = arith.constant 0 : index
    %146 = vector.load %arg2[%c14, %c0_74, %c0_75] : memref<21x1x128xf32, #tpu.memory_space<vmem>>, vector<1x1x128xf32>
    %147 = vector.shape_cast %146 : vector<1x1x128xf32> to vector<1x128xf32>
    %148 = vector.shape_cast %139 : vector<1x128xf32> to vector<1x1x128xf32>
    tpu.vector_store %arg2[%c14, %c0_74, %c0_75], %148 {strides = array<i32>} : memref<21x1x128xf32, #tpu.memory_space<vmem>>, vector<1x1x128xf32>,
    %149 = math.sin %20 : vector<1x128xf32>
    %150 = math.cos %29 : vector<1x128xf32>
    %151 = arith.mulf %149, %150 : vector<1x128xf32>
    %c12 = arith.constant 12 : index
    %c0_76 = arith.constant 0 : index
    %c0_77 = arith.constant 0 : index
    %152 = vector.load %arg2[%c12, %c0_76, %c0_77] : memref<21x1x128xf32, #tpu.memory_space<vmem>>, vector<1x1x128xf32>
    %153 = vector.shape_cast %152 : vector<1x1x128xf32> to vector<1x128xf32>
    %154 = vector.shape_cast %151 : vector<1x128xf32> to vector<1x1x128xf32>
    tpu.vector_store %arg2[%c12, %c0_76, %c0_77], %154 {strides = array<i32>} : memref<21x1x128xf32, #tpu.memory_space<vmem>>, vector<1x1x128xf32>,
    %155 = arith.addf %46, %133 : vector<1x128xf32>
    %156 = arith.addf %155, %136 : vector<1x128xf32>
    %157 = arith.addf %156, %139 : vector<1x128xf32>
    %cst_78 = arith.constant 4.000000e+00 : f32
    %158 = vector.broadcast %cst_78 : f32 to vector<1x128xf32>
    %159 = arith.mulf %158, %157 : vector<1x128xf32>
    %c9_79 = arith.constant 9 : index
    %c0_80 = arith.constant 0 : index
    %c0_81 = arith.constant 0 : index
    %160 = vector.load %arg1[%c9_79, %c0_80, %c0_81] : memref<15x1x128xf32, #tpu.memory_space<vmem>>, vector<1x1x128xf32>
    %161 = vector.shape_cast %160 : vector<1x1x128xf32> to vector<1x128xf32>
    %c10_82 = arith.constant 10 : index
    %c0_83 = arith.constant 0 : index
    %c0_84 = arith.constant 0 : index
    %162 = vector.load %arg1[%c10_82, %c0_83, %c0_84] : memref<15x1x128xf32, #tpu.memory_space<vmem>>, vector<1x1x128xf32>
    %163 = vector.shape_cast %162 : vector<1x1x128xf32> to vector<1x128xf32>
    %164 = arith.addf %161, %163 : vector<1x128xf32>
    %c12_85 = arith.constant 12 : index
    %c0_86 = arith.constant 0 : index
    %c0_87 = arith.constant 0 : index
    %165 = vector.load %arg1[%c12_85, %c0_86, %c0_87] : memref<15x1x128xf32, #tpu.memory_space<vmem>>, vector<1x1x128xf32>
    %166 = vector.shape_cast %165 : vector<1x1x128xf32> to vector<1x128xf32>
    %167 = arith.addf %164, %166 : vector<1x128xf32>
    %c13_88 = arith.constant 13 : index
    %c0_89 = arith.constant 0 : index
    %c0_90 = arith.constant 0 : index
    %168 = vector.load %arg1[%c13_88, %c0_89, %c0_90] : memref<15x1x128xf32, #tpu.memory_space<vmem>>, vector<1x1x128xf32>
    %169 = vector.shape_cast %168 : vector<1x1x128xf32> to vector<1x128xf32>
    %170 = arith.addf %167, %169 : vector<1x128xf32>
    %171 = arith.subf %159, %170 : vector<1x128xf32>
    %172 = arith.mulf %34, %171 : vector<1x128xf32>
    %c20 = arith.constant 20 : index
    %c0_91 = arith.constant 0 : index
    %c0_92 = arith.constant 0 : index
    %173 = vector.load %arg2[%c20, %c0_91, %c0_92] : memref<21x1x128xf32, #tpu.memory_space<vmem>>, vector<1x1x128xf32>
    %174 = vector.shape_cast %173 : vector<1x1x128xf32> to vector<1x128xf32>
    %175 = vector.shape_cast %172 : vector<1x128xf32> to vector<1x1x128xf32>
    tpu.vector_store %arg2[%c20, %c0_91, %c0_92], %175 {strides = array<i32>} : memref<21x1x128xf32, #tpu.memory_space<vmem>>, vector<1x1x128xf32>,
    %176 = math.sin %3 : vector<1x128xf32>
    %177 = math.cos %29 : vector<1x128xf32>
    %178 = arith.mulf %176, %177 : vector<1x128xf32>
    %179 = math.sin %23 : vector<1x128xf32>
    %180 = math.cos %7 : vector<1x128xf32>
    %181 = arith.mulf %179, %180 : vector<1x128xf32>
    %c16 = arith.constant 16 : index
    %c0_93 = arith.constant 0 : index
    %c0_94 = arith.constant 0 : index
    %182 = vector.load %arg2[%c16, %c0_93, %c0_94] : memref<21x1x128xf32, #tpu.memory_space<vmem>>, vector<1x1x128xf32>
    %183 = vector.shape_cast %182 : vector<1x1x128xf32> to vector<1x128xf32>
    %184 = vector.shape_cast %178 : vector<1x128xf32> to vector<1x1x128xf32>
    tpu.vector_store %arg2[%c16, %c0_93, %c0_94], %184 {strides = array<i32>} : memref<21x1x128xf32, #tpu.memory_space<vmem>>, vector<1x1x128xf32>,
    %c17 = arith.constant 17 : index
    %c0_95 = arith.constant 0 : index
    %c0_96 = arith.constant 0 : index
    %185 = vector.load %arg2[%c17, %c0_95, %c0_96] : memref<21x1x128xf32, #tpu.memory_space<vmem>>, vector<1x1x128xf32>
    %186 = vector.shape_cast %185 : vector<1x1x128xf32> to vector<1x128xf32>
    %187 = vector.shape_cast %181 : vector<1x128xf32> to vector<1x1x128xf32>
    tpu.vector_store %arg2[%c17, %c0_95, %c0_96], %187 {strides = array<i32>} : memref<21x1x128xf32, #tpu.memory_space<vmem>>, vector<1x1x128xf32>,
    %188 = math.sin %23 : vector<1x128xf32>
    %189 = math.cos %29 : vector<1x128xf32>
    %190 = arith.mulf %188, %189 : vector<1x128xf32>
    %c15 = arith.constant 15 : index
    %c0_97 = arith.constant 0 : index
    %c0_98 = arith.constant 0 : index
    %191 = vector.load %arg2[%c15, %c0_97, %c0_98] : memref<21x1x128xf32, #tpu.memory_space<vmem>>, vector<1x1x128xf32>
    %192 = vector.shape_cast %191 : vector<1x1x128xf32> to vector<1x128xf32>
    %193 = vector.shape_cast %190 : vector<1x128xf32> to vector<1x1x128xf32>
    tpu.vector_store %arg2[%c15, %c0_97, %c0_98], %193 {strides = array<i32>} : memref<21x1x128xf32, #tpu.memory_space<vmem>>, vector<1x1x128xf32>,
    %194 = arith.addf %94, %136 : vector<1x128xf32>
    %195 = arith.addf %194, %178 : vector<1x128xf32>
    %196 = arith.addf %195, %181 : vector<1x128xf32>
    %cst_99 = arith.constant 4.000000e+00 : f32
    %197 = vector.broadcast %cst_99 : f32 to vector<1x128xf32>
    %198 = arith.mulf %197, %196 : vector<1x128xf32>
    %c10_100 = arith.constant 10 : index
    %c0_101 = arith.constant 0 : index
    %c0_102 = arith.constant 0 : index
    %199 = vector.load %arg1[%c10_100, %c0_101, %c0_102] : memref<15x1x128xf32, #tpu.memory_space<vmem>>, vector<1x1x128xf32>
    %200 = vector.shape_cast %199 : vector<1x1x128xf32> to vector<1x128xf32>
    %c11_103 = arith.constant 11 : index
    %c0_104 = arith.constant 0 : index
    %c0_105 = arith.constant 0 : index
    %201 = vector.load %arg1[%c11_103, %c0_104, %c0_105] : memref<15x1x128xf32, #tpu.memory_space<vmem>>, vector<1x1x128xf32>
    %202 = vector.shape_cast %201 : vector<1x1x128xf32> to vector<1x128xf32>
    %203 = arith.addf %200, %202 : vector<1x128xf32>
    %c13_106 = arith.constant 13 : index
    %c0_107 = arith.constant 0 : index
    %c0_108 = arith.constant 0 : index
    %204 = vector.load %arg1[%c13_106, %c0_107, %c0_108] : memref<15x1x128xf32, #tpu.memory_space<vmem>>, vector<1x1x128xf32>
    %205 = vector.shape_cast %204 : vector<1x1x128xf32> to vector<1x128xf32>
    %206 = arith.addf %203, %205 : vector<1x128xf32>
    %c14_109 = arith.constant 14 : index
    %c0_110 = arith.constant 0 : index
    %c0_111 = arith.constant 0 : index
    %207 = vector.load %arg1[%c14_109, %c0_110, %c0_111] : memref<15x1x128xf32, #tpu.memory_space<vmem>>, vector<1x1x128xf32>
    %208 = vector.shape_cast %207 : vector<1x1x128xf32> to vector<1x128xf32>
    %209 = arith.addf %206, %208 : vector<1x128xf32>
    %210 = arith.subf %198, %209 : vector<1x128xf32>
    %211 = arith.mulf %34, %210 : vector<1x128xf32>
    %212 = arith.addf %82, %127 : vector<1x128xf32>
    %213 = arith.addf %212, %172 : vector<1x128xf32>
    %214 = arith.addf %213, %211 : vector<1x128xf32>
    %215 = arith.subf %214, %11 : vector<1x128xf32>
    %216 = math.absf %30 : vector<1x128xf32>
    %217 = math.absf %31 : vector<1x128xf32>
    %218 = arith.minimumf %216, %217 : vector<1x128xf32>
    %cst_112 = arith.constant 2.500000e-01 : f32
    %219 = vector.broadcast %cst_112 : f32 to vector<1x128xf32>
    %220 = arith.mulf %218, %219 : vector<1x128xf32>
    %cst_113 = arith.constant 1.59785804E-6 : f32
    %221 = vector.broadcast %cst_113 : f32 to vector<1x128xf32>
    %222 = arith.cmpf olt, %220, %221 : vector<1x128xf32>
    %223 = math.absf %215 : vector<1x128xf32>
    %cst_114 = arith.constant 1.500000e+01 : f32
    %224 = vector.broadcast %cst_114 : f32 to vector<1x128xf32>
    %225 = arith.mulf %224, %9 : vector<1x128xf32>
    %226 = arith.cmpf ole, %223, %225 : vector<1x128xf32>
    %227 = arith.ori %226, %222 : vector<1x128xi1>
    %cst_115 = arith.constant 0.0666666701 : f32
    %228 = vector.broadcast %cst_115 : f32 to vector<1x128xf32>
    %229 = arith.mulf %215, %228 : vector<1x128xf32>
    %230 = arith.addf %214, %229 : vector<1x128xf32>
    %c0_116 = arith.constant 0 : index
    %c0_117 = arith.constant 0 : index
    %c0_118 = arith.constant 0 : index
    %231 = vector.load %arg2[%c0_116, %c0_117, %c0_118] : memref<21x1x128xf32, #tpu.memory_space<vmem>>, vector<1x1x128xf32>
    %232 = vector.shape_cast %231 : vector<1x1x128xf32> to vector<1x128xf32>
    %233 = vector.shape_cast %230 : vector<1x128xf32> to vector<1x1x128xf32>
    tpu.vector_store %arg2[%c0_116, %c0_117, %c0_118], %233 {strides = array<i32>} : memref<21x1x128xf32, #tpu.memory_space<vmem>>, vector<1x1x128xf32>,
    %234 = arith.extui %227 : vector<1x128xi1> to vector<1x128xi32>
    %235 = arith.sitofp %234 : vector<1x128xi32> to vector<1x128xf32>
    %c1_119 = arith.constant 1 : index
    %c0_120 = arith.constant 0 : index
    %c0_121 = arith.constant 0 : index
    %236 = vector.load %arg2[%c1_119, %c0_120, %c0_121] : memref<21x1x128xf32, #tpu.memory_space<vmem>>, vector<1x1x128xf32>
    %237 = vector.shape_cast %236 : vector<1x1x128xf32> to vector<1x128xf32>
    %238 = vector.shape_cast %235 : vector<1x128xf32> to vector<1x1x128xf32>
    tpu.vector_store %arg2[%c1_119, %c0_120, %c0_121], %238 {strides = array<i32>} : memref<21x1x128xf32, #tpu.memory_space<vmem>>, vector<1x1x128xf32>,
    return
  }
  func.func @transform_0(%arg0: i32) -> (i32, i32, i32) {
    %c0_i32 = arith.constant 0 : i32
    %c0_i32_0 = arith.constant 0 : i32
    %c0_i32_1 = arith.constant 0 : i32
    return %c0_i32, %arg0, %c0_i32_0 : i32, i32, i32
  }
  func.func @transform_1(%arg0: i32) -> (i32, i32, i32) {
    %c0_i32 = arith.constant 0 : i32
    %c0_i32_0 = arith.constant 0 : i32
    %c0_i32_1 = arith.constant 0 : i32
    return %c0_i32, %arg0, %c0_i32_0 : i32, i32, i32
  }
}

</mosaic_0001>

<bundles_post_ra>
// kernel: run.1
= control target key start
LH: loop header
LB: loop body
LE: loop exit
PB: predicated region body
PF: predicated region fallthrough
CT: control target
= control target key end

     0   :  { %6 = vsyncpa [#allocation3], 0  ;;  %s1830_s9 = smov [#allocation2]   ;;  %s1831_s11 = smov 16   ;;  %s3215_s0 = inlined_call_operand.hbm [shape: f32[15,1,128], index: 0, kind: input, shape index: {}]   ;;  %s3216_s1 = inlined_call_operand.vmem [shape: f32[21,1,128], index: 1, kind: output, shape index: {}]  }
   0x1   :  { %s11_s8 = sshll.u32 %s3215_s0, 4  ;;  %s13_s10 = sshll.u32 %s1830_s9, 4  ;;  %s12_s8 = int_to_ptr.hbm [resolvable:$true] %s11_s8  ;;  %s14_s10 = int_to_ptr.vmem [resolvable:$true] %s13_s10 }
   0x2   :  { %s1832_s12 = smov 1  }
   0x3   :  { %19 = dma.hbm_to_vmem [thread:$0]  %s12_s8, 240, %s14_s10, [#allocation3], %s1831_s11, %s1831_s11, %s1832_s12  }
   0x4   :  { %1828 = dma.done.wait [#allocation3], 240  }
   0x5   :  { %1829 = vsyncadd [#allocation3], 4294967056  ;;  %v1854_v0 = vld [vmem:[#allocation2] sm:$0x1]  ;;  %v26_v1 = vld [vmem:[#allocation2 + $0x1] sm:$0x1] }
   0x6   :  { %v1856_v2 = vld [vmem:[#allocation2 + $0x2] sm:$0x1]  ;;  %v35_v3 = vadd.f32 %v26_v1, %v1854_v0  ;;  %v364_v10 = vand.u32 2139095040, %v1854_v0  ;;  %v30_v18 = vld [vmem:[#allocation2 + $0x3] sm:$0x1] }
   0x7   :  { %v206_v4 = vand.u32 2147483647, %v1856_v2  ;;  %v209_v5 = vand.u32 2139095040, %v1856_v2  ;;  %v1877_v27 = vadd.f32 %v30_v18, %v1856_v2  ;;  %v361_v29 = vand.u32 2147483647, %v1854_v0 }
   0x8   :  { %v1861_v6 = vmul.f32 0.5, %v35_v3  ;;  %v365_v17 = vshrl.u32 %v364_v10, 23  ;;  %v1833_v34 = vmov 683565275   ;;  %v1834_v36 = vmov 2475754826  }
   0x9   :  { %v210_v7 = vshrl.u32 %v209_v5, 23  ;;  %v213_v8 = vand.u32 8388607, %v206_v4  ;;  %v1835_v39 = vmov 2131351028  }
   0xa   :  { %v39_v9 = vadd.f32 %v1861_v6, %v1854_v0  ;;  %v1742_v26 = vadd.s32 4294967169, %v365_v17  ;;  %v1836_v45 = vmov 2102212464   ;;  %v1837_v48 = vmov 920167782  }
   0xb   :  { %v1739_v11 = vadd.s32 4294967169, %v210_v7  ;;  %v214_v13 = vor.u32 8388608, %v213_v8 }
   0xc   :  { %v1868_v12 = vmul.f32 0.5, %v39_v9  ;;  %v1895_v43 = vadd.s32 1, %v1742_v26  ;;  %v1838_v9 = vmov 1326507024  }
   0xd   :  { %v216_v14 = vadd.s32 1, %v1739_v11  ;;  %v1874_v22 = vshll.u32 %v214_v13, 8 }
   0xe   :  { %v51_v15 = vand.u32 2147483647, %v1868_v12  ;;  %v54_v16 = vand.u32 2139095040, %v1868_v12 }
   0xf   :  { %vm217_vm0 = vcmp.gt.s32.totalorder %v216_v14, 0  ;;  %v1885_v33 = vand.u32 65535, %v1874_v22  ;;  %v1893_v42 = vshrl.u32 %v1874_v22, 16 }
  0x10   :  { %v55_v19 = vshrl.u32 %v54_v16, 23  ;;  %v58_v20 = vand.u32 8388607, %v51_v15  ;;  %v218_v21 = vsel %vm217_vm0, %v216_v14, 0  ;;  %vm372_vm0 = vcmp.gt.s32.totalorder %v1895_v43, 0 }
  0x11   :  { %v220_v23 = vand.u32 31, %v218_v21  ;;  %v1882_v32 = vshrl.u32 %v218_v21, 5 }
  0x12   :  { %v1736_v24 = vadd.s32 4294967169, %v55_v19  ;;  %v59_v25 = vor.u32 8388608, %v58_v20 }
  0x13   :  { %v221_v28 = vsub.s32 32, %v220_v23  ;;  %v223_v35 = vshll.u32 %v1833_v34, %v220_v23  ;;  %v226_v38 = vshll.u32 %v1834_v36, %v220_v23  ;;  %v229_v41 = vshll.u32 %v1835_v39, %v220_v23 }
  0x14   :  { %v61_v30 = vadd.s32 1, %v1736_v24  ;;  %v1880_v31 = vshll.u32 %v59_v25, 8  ;;  %v232_v47 = vshll.u32 %v1836_v45, %v220_v23  ;;  %v235_v53 = vshll.u32 %v1837_v48, %v220_v23 }
  0x15   :  { %v224_v37 = vshrl.u32 %v1834_v36, %v221_v28  ;;  %v227_v40 = vshrl.u32 %v1835_v39, %v221_v28  ;;  %v230_v46 = vshrl.u32 %v1836_v45, %v221_v28  ;;  %v233_v49 = vshrl.u32 %v1837_v48, %v221_v28 }
  0x16   :  { %vm62_vm1 = vcmp.gt.s32.totalorder %v61_v30, 0  ;;  %v100_v51 = vand.u32 65535, %v1880_v31  ;;  %v1902_v52 = vshrl.u32 %v1833_v34, %v221_v28  ;;  %v1906_v55 = vshrl.u32 %v1880_v31, 16 }
  0x17   :  { %v63_v44 = vsel %vm62_vm1, %v61_v30, 0  ;;  %v1908_v56 = vor.u32 %v224_v37, %v223_v35  ;;  %v1910_v57 = vor.u32 %v227_v40, %v226_v38  ;;  %v1917_v1 = vor.u32 %v230_v46, %v229_v41 }
  0x18   :  { %v65_v50 = vand.u32 31, %v63_v44  ;;  %v64_v54 = vshrl.u32 %v63_v44, 5  ;;  %v234_v3 = vor.u32 %v233_v49, %v232_v47  ;;  %v236_v10 = vshrl.u32 %v1838_v9, %v221_v28 }
  0x19   :  { %vm238_vm5 = vcmp.lt.s32.totalorder %v1882_v32, 1  ;;  %vm241_vm7 = vcmp.lt.s32.totalorder %v1882_v32, 4  ;;  %vm239_vm8 = vcmp.lt.s32.totalorder %v1882_v32, 2  ;;  %vm240_vm9 = vcmp.lt.s32.totalorder %v1882_v32, 3 }
  0x1a   :  { %v66_v58 = vsub.s32 32, %v65_v50  ;;  %v68_v59 = vshll.u32 %v1833_v34, %v65_v50  ;;  %v71_v60 = vshll.u32 %v1834_v36, %v65_v50  ;;  %v74_v61 = vshll.u32 %v1835_v39, %v65_v50 }
  0x1b   :  { %v77_v62 = vshll.u32 %v1836_v45, %v65_v50  ;;  %v80_v63 = vshll.u32 %v1837_v48, %v65_v50  ;;  %vm83_vm2 = vcmp.lt.s32.totalorder %v64_v54, 1  ;;  %vm86_vm3 = vcmp.lt.s32.totalorder %v64_v54, 4 }
  0x1c   :  { %v69_v5 = vshrl.u32 %v1834_v36, %v66_v58  ;;  %v72_v7 = vshrl.u32 %v1835_v39, %v66_v58  ;;  %v75_v8 = vshrl.u32 %v1836_v45, %v66_v58  ;;  %v67_v11 = vshrl.u32 %v1833_v34, %v66_v58 }
  0x1d   :  { %v78_v13 = vshrl.u32 %v1837_v48, %v66_v58  ;;  %v81_v14 = vshrl.u32 %v1838_v9, %v66_v58  ;;  %vm85_vm4 = vcmp.lt.s32.totalorder %v64_v54, 3  ;;  %vm84_vm6 = vcmp.lt.s32.totalorder %v64_v54, 2 }
  0x1e   :  { %v70_v16 = vor.u32 %v69_v5, %v68_v59  ;;  %v73_v17 = vor.u32 %v72_v7, %v71_v60  ;;  %v76_v18 = vor.u32 %v75_v8, %v74_v61  ;;  %v237_v28 = vor.u32 %v236_v10, %v235_v53 }
  0x1f   :  { %v79_v19 = vor.u32 %v78_v13, %v77_v62  ;;  %v82_v20 = vor.u32 %v81_v14, %v80_v63  ;;  %v246_v53 = vsel %vm238_vm5, %v1908_v56, %v1910_v57  ;;  %v247_v58 = vsel %vm241_vm7, %v234_v3, 920167782 }
  0x20   :  { %v88_v21 = vsel %vm86_vm3, %v76_v18, 2102212464  ;;  %v91_v23 = vsel %vm83_vm2, %v70_v16, %v73_v17  ;;  %v95_v24 = vsel %vm83_vm2, %v73_v17, %v76_v18  ;;  %v87_v30 = vsel %vm83_vm2, %v67_v11, %v70_v16 }
  0x21   :  { %v92_v25 = vsel %vm86_vm3, %v79_v19, 920167782  ;;  %v96_v26 = vsel %vm86_vm3, %v82_v20, 1326507024  ;;  %v89_v35 = vsel %vm85_vm4, %v73_v17, %v88_v21  ;;  %v250_v59 = vsel %vm238_vm5, %v1910_v57, %v1917_v1 }
  0x22   :  { %v93_v37 = vsel %vm85_vm4, %v76_v18, %v92_v25  ;;  %v97_v38 = vsel %vm85_vm4, %v79_v19, %v96_v26  ;;  %v1936_v50 = vsel %vm84_vm6, %v87_v30, %v89_v35  ;;  %v251_v54 = vsel %vm241_vm7, %v237_v28, 1326507024 }
  0x23   :  { %v94_v40 = vsel %vm84_vm6, %v91_v23, %v93_v37  ;;  %v98_v41 = vsel %vm84_vm6, %v95_v24, %v97_v38  ;;  %v248_v21 = vsel %vm240_vm9, %v1917_v1, %v247_v58  ;;  %v1839_v23 = vmov 0  }
  0x24   :  { %v102_v44 = vand.u32 65535, %v98_v41  ;;  %v103_v46 = vshrl.u32 %v98_v41, 16  ;;  %v124_v47 = vand.u32 65535, %v94_v40  ;;  %v125_v49 = vshrl.u32 %v94_v40, 16 }
  0x25   :  { %vm53_vm6 = vcmp.lt.s32.totalorder %v1868_v12, 0 }
  0x26   :  { %v104_v60 = vmul.u32 %v102_v44, %v100_v51  ;;  %v105_v61 = vmul.u32 %v103_v46, %v100_v51  ;;  %v106_v62 = vmul.u32 %v102_v44, %v1906_v55  ;;  %v107_v63 = vmul.u32 %v103_v46, %v1906_v55 }
  0x27   :  { %v126_v5 = vmul.u32 %v124_v47, %v100_v51  ;;  %v127_v7 = vmul.u32 %v125_v49, %v100_v51  ;;  %v128_v8 = vmul.u32 %v124_v47, %v1906_v55  ;;  %v129_v14 = vmul.u32 %v125_v49, %v1906_v55 }
  0x28   :  { %v108_v10 = vshll.u32 %v105_v61, 16  ;;  %v109_v11 = vshrl.u32 %v105_v61, 16  ;;  %v110_v13 = vshll.u32 %v106_v62, 16  ;;  %v111_v16 = vshrl.u32 %v106_v62, 16 }
  0x29   :  { %v130_v17 = vshll.u32 %v127_v7, 16  ;;  %v131_v18 = vshrl.u32 %v127_v7, 16  ;;  %v132_v19 = vshll.u32 %v128_v8, 16  ;;  %v252_v51 = vsel %vm240_vm9, %v234_v3, %v251_v54 }
  0x2a   :  { %vm112_vm10 = vc.u32 %v104_v60, %v108_v10  ;;  %v114_v20 = vadd.s32 %v108_v10, %v104_v60  ;;  %v249_v55 = vsel %vm239_vm8, %v246_v53, %v248_v21  ;;  %v253_v30 = vsel %vm239_vm8, %v250_v59, %v252_v51 }
  0x2b   :  { %v113_v24 = vsel %vm112_vm10, 1, %v1839_v23  ;;  %vm134_vm11 = vc.u32 %v126_v5, %v130_v17  ;;  %v136_v25 = vadd.s32 %v130_v17, %v126_v5  ;;  %v133_v37 = vshrl.u32 %v128_v8, 16 }
  0x2c   :  { %v115_v26 = vadd.s32 %v113_v24, %v107_v63  ;;  %vm116_vm12 = vc.u32 %v114_v20, %v110_v13  ;;  %v135_v28 = vsel %vm134_vm11, 1, %v1839_v23  ;;  %v257_v41 = vand.u32 65535, %v253_v30 }
  0x2d   :  { %v117_v35 = vsel %vm116_vm12, 1, %v1839_v23  ;;  %v137_v38 = vadd.s32 %v135_v28, %v129_v14  ;;  %vm138_vm13 = vc.u32 %v136_v25, %v132_v19  ;;  %v258_v44 = vshrl.u32 %v253_v30, 16 }
  0x2e   :  { %v119_v3 = vadd.s32 %v117_v35, %v115_v26  ;;  %v139_v40 = vsel %vm138_vm13, 1, %v1839_v23  ;;  %v1967_v46 = vadd.s32 %v136_v25, %v132_v19  ;;  %v279_v49 = vand.u32 65535, %v249_v55 }
  0x2f   :  { %v141_v47 = vadd.s32 %v139_v40, %v137_v38  ;;  %v280_v53 = vshrl.u32 %v249_v55, 16  ;;  %v259_v60 = vmul.u32 %v257_v41, %v1885_v33  ;;  %v260_v59 = vmul.u32 %v258_v44, %v1885_v33 }
  0x30   :  { %v120_v58 = vadd.s32 %v119_v3, %v109_v11  ;;  %v261_v61 = vmul.u32 %v257_v41, %v1893_v42  ;;  %v242_v54 = vsel %vm238_vm5, %v1902_v52, %v1908_v56  ;;  %v243_v63 = vsel %vm241_vm7, %v1917_v1, 2102212464 }
  0x31   :  { %v142_v62 = vadd.s32 %v141_v47, %v131_v18  ;;  %v282_v5 = vmul.u32 %v280_v53, %v1885_v33  ;;  %v262_v8 = vmul.u32 %v258_v44, %v1893_v42  ;;  %v263_v10 = vshll.u32 %v260_v59, 16 }
  0x32   :  { %v1980_v7 = vadd.s32 %v120_v58, %v111_v16  ;;  %v265_v11 = vshll.u32 %v261_v61, 16  ;;  %v144_v14 = vmul.u32 %v1880_v31, %v1936_v50  ;;  %v281_v17 = vmul.u32 %v279_v49, %v1885_v33 }
  0x33   :  { %v143_v13 = vadd.s32 %v142_v62, %v133_v37  ;;  %v283_v52 = vmul.u32 %v279_v49, %v1893_v42  ;;  %vm267_vm15 = vc.u32 %v259_v60, %v263_v10  ;;  %v269_v56 = vadd.s32 %v263_v10, %v259_v60 }
  0x34   :  { %vm146_vm14 = vc.u32 %v1980_v7, %v1967_v46  ;;  %v268_v16 = vsel %vm267_vm15, 1, %v1839_v23  ;;  %v284_v18 = vmul.u32 %v280_v53, %v1893_v42  ;;  %v285_v19 = vshll.u32 %v282_v5, 16 }
  0x35   :  { %v147_v1 = vadd.s32 1, %v143_v13  ;;  %v264_v20 = vshrl.u32 %v260_v59, 16  ;;  %v270_v21 = vadd.s32 %v268_v16, %v262_v8  ;;  %vm271_vm1 = vc.u32 %v269_v56, %v265_v11 }
  0x36   :  { %v287_v31 = vshll.u32 %v283_v52, 16  ;;  %v272_v50 = vsel %vm271_vm1, 1, %v1839_v23  ;;  %vm289_vm2 = vc.u32 %v281_v17, %v285_v19  ;;  %v291_v51 = vadd.s32 %v285_v19, %v281_v17 }
  0x37   :  { %v148_v33 = vsel %vm146_vm14, %v147_v1, %v143_v13  ;;  %v266_v25 = vshrl.u32 %v261_v61, 16  ;;  %v274_v55 = vadd.s32 %v272_v50, %v270_v21  ;;  %v290_v26 = vsel %vm289_vm2, 1, %v1839_v23 }
  0x38   :  { %v149_v24 = vadd.s32 %v148_v33, %v144_v14  ;;  %v244_v28 = vsel %vm240_vm9, %v1910_v57, %v243_v63  ;;  %v286_v42 = vshrl.u32 %v282_v5, 16  ;;  %v292_v30 = vadd.s32 %v290_v26, %v284_v18 }
  0x39   :  { %vm293_vm3 = vc.u32 %v291_v51, %v287_v31  ;;  %v275_v37 = vadd.s32 %v274_v55, %v264_v20  ;;  %v373_v3 = vsel %vm372_vm0, %v1895_v43, 0  ;;  %v288_v40 = vshrl.u32 %v283_v52, 16 }
  0x3a   :  { %v150_v35 = vadd.s32 536870912, %v149_v24  ;;  %v294_v38 = vsel %vm293_vm3, 1, %v1839_v23  ;;  %v375_v44 = vand.u32 31, %v373_v3  ;;  %v2005_v53 = vadd.s32 %v291_v51, %v287_v31 }
  0x3b   :  { %v296_v41 = vadd.s32 %v294_v38, %v292_v30  ;;  %v2003_v49 = vadd.s32 %v275_v37, %v266_v25  ;;  %v2008_v57 = vmul.f32 0.5, %v1877_v27  ;;  %v245_v58 = vsel %vm239_vm8, %v242_v54, %v244_v28 }
  0x3c   :  { %v2001_v47 = vshrl.u32 %v150_v35, 30  ;;  %v368_v59 = vand.u32 8388607, %v361_v29  ;;  %v376_v61 = vsub.s32 32, %v375_v44  ;;  %v299_v5 = vmul.u32 %v1874_v22, %v245_v58 }
  0x3d   :  { %v297_v60 = vadd.s32 %v296_v41, %v286_v42  ;;  %vm301_vm4 = vc.u32 %v2003_v49, %v2005_v53  ;;  %v43_v27 = vadd.f32 %v2008_v57, %v1856_v2  ;;  %v378_v54 = vshll.u32 %v1833_v34, %v375_v44 }
  0x3e   :  { %v152_v43 = vshll.u32 %v2001_v47, 30  ;;  %v369_v32 = vor.u32 8388608, %v368_v59  ;;  %v379_v11 = vshrl.u32 %v1834_v36, %v376_v61  ;;  %v381_v13 = vshll.u32 %v1834_v36, %v375_v44 }
  0x3f   :  { %v298_v62 = vadd.s32 %v297_v60, %v288_v40  ;;  %v382_v17 = vshrl.u32 %v1835_v39, %v376_v61  ;;  %v384_v22 = vshll.u32 %v1835_v39, %v375_v44  ;;  %v385_v52 = vshrl.u32 %v1836_v45, %v376_v61 }
  0x40   :  { %v153_v63 = vsub.s32 %v149_v24, %v152_v43  ;;  %v387_v16 = vshll.u32 %v1836_v45, %v375_v44  ;;  %v388_v18 = vshrl.u32 %v1837_v48, %v376_v61  ;;  %v2028_v20 = vshrl.u32 %v373_v3, 5 }
  0x41   :  { %v302_v8 = vadd.s32 1, %v298_v62  ;;  %v390_v21 = vshll.u32 %v1837_v48, %v375_v44  ;;  %v391_v31 = vshrl.u32 %v1838_v9, %v376_v61  ;;  %v2032_v33 = vmul.f32 0.5, %v43_v27 }
  0x42   :  { %vm154_vm5 = vcmp.lt.s32.totalorder %v153_v63, 0  ;;  %v155_v10 = vsub.s32 0, %v153_v63  ;;  %v145_v50 = vadd.s32 %v1967_v46, %v1980_v7  ;;  %v175_v25 = vsub.s32 4, %v2001_v47 }
  0x43   :  { %v303_v14 = vsel %vm301_vm4, %v302_v8, %v298_v62  ;;  %v380_v55 = vor.u32 %v379_v11, %v378_v54  ;;  %v2038_v26 = vshll.u32 %v369_v32, 8  ;;  %v2042_v42 = vor.u32 %v382_v17, %v381_v13 }
  0x44   :  { %v156_v56 = vsel %vm154_vm5, %v155_v10, %v153_v63  ;;  %v304_v1 = vadd.s32 %v303_v14, %v299_v5  ;;  %v386_v30 = vor.u32 %v385_v52, %v384_v22  ;;  %v389_v35 = vor.u32 %v388_v18, %v387_v16 }
  0x45   :  { %v157_v19 = vclz %v156_v56  ;;  %v392_v37 = vor.u32 %v391_v31, %v390_v21  ;;  %vm393_vm8 = vcmp.lt.s32.totalorder %v2028_v20, 1  ;;  %vm396_vm9 = vcmp.lt.s32.totalorder %v2028_v20, 4 }
  0x46   :  { %v305_v51 = vadd.s32 536870912, %v304_v1  ;;  %vm2048_vm10 = vcmp.le.f32.partialorder %v51_v15, 0.7853982  ;;  %v377_v3 = vshrl.u32 %v1833_v34, %v376_v61  ;;  %vm394_vm11 = vcmp.lt.s32.totalorder %v2028_v20, 2 }
  0x47   :  { %v1737_v24 = vadd.s32 4294967294, %v157_v19  ;;  %vm395_vm12 = vcmp.lt.s32.totalorder %v2028_v20, 3  ;;  %v401_v15 = vsel %vm393_vm8, %v380_v55, %v2042_v42  ;;  %v402_v60 = vsel %vm396_vm9, %v389_v35, 920167782 }
  0x48   :  { %v2040_v28 = vshrl.u32 %v305_v51, 30  ;;  %v405_v59 = vsel %vm393_vm8, %v2042_v42, %v386_v30  ;;  %v406_v62 = vsel %vm396_vm9, %v392_v37, 1326507024  ;;  %v411_v8 = vshrl.u32 %v2038_v26, 16 }
  0x49   :  { %vm1738_vm7 = vcmp.lt.s32.totalorder %v1737_v24, 0  ;;  %v407_v27 = vsel %vm395_vm12, %v389_v35, %v406_v62  ;;  %v403_v10 = vsel %vm395_vm12, %v386_v30, %v402_v60  ;;  %v176_v13 = vsel %vm53_vm6, %v175_v25, %v2001_v47 }
  0x4a   :  { %v160_v7 = vsel %vm1738_vm7, 0, %v1737_v24  ;;  %v307_v38 = vshll.u32 %v2040_v28, 30  ;;  %v408_v11 = vsel %vm394_vm11, %v405_v59, %v407_v27  ;;  %v519_v16 = vand.u32 2139095040, %v2032_v33 }
  0x4b   :  { %v161_v40 = vsub.s32 32, %v160_v7  ;;  %v162_v41 = vshll.u32 %v153_v63, %v160_v7  ;;  %v165_v44 = vsub.s32 4294967266, %v160_v7  ;;  %v410_v63 = vand.u32 65535, %v2038_v26 }
  0x4c   :  { %v2056_v58 = vsub.s32 %v304_v1, %v307_v38  ;;  %v412_v17 = vand.u32 65535, %v408_v11  ;;  %v413_v22 = vshrl.u32 %v408_v11, 16  ;;  %v404_v18 = vsel %vm394_vm11, %v401_v15, %v403_v10 }
  0x4d   :  { %v163_v43 = vshrl.u32 %v145_v50, %v161_v40  ;;  %v166_v61 = vadd.s32 127, %v165_v44  ;;  %v178_v47 = vsel %vm2048_vm10, 0, %v176_v13  ;;  %v300_v51 = vadd.s32 %v2005_v53, %v2003_v49 }
  0x4e   :  { %vm309_vm13 = vcmp.lt.s32.totalorder %v2056_v58, 0  ;;  %v310_v5 = vsub.s32 0, %v2056_v58  ;;  %v414_v19 = vmul.u32 %v412_v17, %v410_v63  ;;  %v415_v21 = vmul.u32 %v413_v22, %v410_v63 }
  0x4f   :  { %v164_v32 = vor.u32 %v163_v43, %v162_v41  ;;  %v167_v54 = vshll.u32 %v166_v61, 23  ;;  %v2085_v31 = vmul.u32 %v412_v17, %v411_v8  ;;  %v2093_v25 = vsel %vm393_vm8, %v377_v3, %v380_v55 }
  0x50   :  { %v311_v14 = vsel %vm309_vm13, %v310_v5, %v2056_v58  ;;  %v398_v35 = vsel %vm396_vm9, %v386_v30, 2102212464  ;;  %v418_v37 = vshll.u32 %v415_v21, 16  ;;  %v434_v7 = vand.u32 65535, %v404_v18 }
  0x51   :  { %v168_v52 = vor.u32 4788187, %v167_v54  ;;  %v171_v56 = vcvt.s32.f32 %v164_v32  ;;  %v312_v1 = vclz %v311_v14  ;;  %vm208_vm14 = vcmp.lt.s32.totalorder %v1856_v2, 0 }
  0x52   :  { %v417_v40 = vmul.u32 %v413_v22, %v411_v8  ;;  %v435_v41 = vshrl.u32 %v404_v18, 16  ;;  %v420_v15 = vshll.u32 %v2085_v31, 16  ;;  %vm422_vm0 = vc.u32 %v414_v19, %v418_v37 }
  0x53   :  { %v169_v50 = vand.u32 2147483647, %v168_v52  ;;  %v1740_v24 = vadd.s32 4294967294, %v312_v1  ;;  %v424_v49 = vadd.s32 %v418_v37, %v414_v19  ;;  %v195_v59 = vadd.s32 3, %v178_v47 }
  0x54   :  { %v330_v30 = vsub.s32 4, %v2040_v28  ;;  %v423_v43 = vsel %vm422_vm0, 1, %v1839_v23  ;;  %v436_v61 = vmul.u32 %v434_v7, %v410_v63  ;;  %vm2106_vm1 = vcmp.le.f32.partialorder %v206_v4, 0.7853982 }
  0x55   :  { %v172_v38 = vmul.f32 %v171_v56, %v169_v50  ;;  %vm1741_vm15 = vcmp.lt.s32.totalorder %v1740_v24, 0  ;;  %v425_v54 = vadd.s32 %v423_v43, %v417_v40  ;;  %vm426_vm2 = vc.u32 %v424_v49, %v420_v15 }
  0x56   :  { %v315_v44 = vsel %vm1741_vm15, 0, %v1740_v24  ;;  %v437_v10 = vmul.u32 %v435_v41, %v410_v63  ;;  %v438_v11 = vmul.u32 %v434_v7, %v411_v8  ;;  %v427_v4 = vsel %vm426_vm2, 1, %v1839_v23 }
  0x57   :  { %v173_v53 = vxor.u32 2147483648, %v172_v38  ;;  %v316_v60 = vsub.s32 32, %v315_v44  ;;  %v317_v55 = vshll.u32 %v2056_v58, %v315_v44  ;;  %v320_v3 = vsub.s32 4294967266, %v315_v44 }
  0x58   :  { %v419_v22 = vshrl.u32 %v415_v21, 16  ;;  %v429_v52 = vadd.s32 %v427_v4, %v425_v54  ;;  %v439_v56 = vmul.u32 %v435_v41, %v411_v8  ;;  %v440_v1 = vshll.u32 %v437_v10, 16 }
  0x59   :  { %v174_v62 = vsel %vm53_vm6, %v173_v53, %v172_v38  ;;  %v318_v27 = vshrl.u32 %v300_v51, %v316_v60  ;;  %v321_v32 = vadd.s32 127, %v320_v3  ;;  %v331_v63 = vsel %vm208_vm14, %v330_v30, %v2040_v28 }
  0x5a   :  { %v2113_v58 = vsel %vm2048_vm10, %v1868_v12, %v174_v62  ;;  %v399_v47 = vsel %vm395_vm12, %v2042_v42, %v398_v35  ;;  %v442_v51 = vshll.u32 %v438_v11, 16  ;;  %vm444_vm3 = vc.u32 %v436_v61, %v440_v1 }
  0x5b   :  { %v179_v13 = vmul.f32 %v2113_v58, %v2113_v58  ;;  %v319_v14 = vor.u32 %v318_v27, %v317_v55  ;;  %v322_v17 = vshll.u32 %v321_v32, 23  ;;  %v446_v7 = vadd.s32 %v440_v1, %v436_v61 }
  0x5c   :  { %v421_v8 = vshrl.u32 %v2085_v31, 16  ;;  %v430_v38 = vadd.s32 %v429_v52, %v419_v22  ;;  %v445_v40 = vsel %vm444_vm3, 1, %v1839_v23  ;;  %v520_v41 = vshrl.u32 %v519_v16, 23 }
  0x5d   :  { %v180_v18 = vmul.f32 -0.001358992, %v179_v13  ;;  %v187_v19 = vmul.f32 -0.00019511016, %v179_v13  ;;  %v323_v50 = vor.u32 4788187, %v322_v17  ;;  %v326_v46 = vcvt.s32.f32 %v319_v14 }
  0x5e   :  { %v447_v28 = vadd.s32 %v445_v40, %v439_v56  ;;  %v333_v53 = vsel %vm2106_vm1, 0, %v331_v63  ;;  %v441_v42 = vshrl.u32 %v437_v10, 16  ;;  %vm448_vm4 = vc.u32 %v446_v7, %v442_v51 }
  0x5f   :  { %v181_v24 = vadd.f32 0.041655596, %v180_v18  ;;  %v188_v37 = vadd.f32 0.008332121, %v187_v19  ;;  %v324_v21 = vand.u32 2147483647, %v323_v50  ;;  %v2129_v31 = vadd.s32 %v430_v38, %v421_v8 }
  0x60   :  { %v1745_v35 = vadd.s32 4294967169, %v520_v41  ;;  %v449_v30 = vsel %vm448_vm4, 1, %v1839_v23  ;;  %v443_v43 = vshrl.u32 %v438_v11, 16  ;;  %v2131_v61 = vadd.s32 %v446_v7, %v442_v51 }
  0x61   :  { %v182_v44 = vmul.f32 %v181_v24, %v179_v13  ;;  %v189_v15 = vmul.f32 %v188_v37, %v179_v13  ;;  %v327_v49 = vmul.f32 %v326_v46, %v324_v21  ;;  %v451_v16 = vadd.s32 %v449_v30, %v447_v28 }
  0x62   :  { %v526_v54 = vadd.s32 1, %v1745_v35  ;;  %v400_v14 = vsel %vm394_vm11, %v2093_v25, %v399_v47  ;;  %v516_v11 = vand.u32 2147483647, %v2032_v33  ;;  %v2144_v22 = vand.u32 3, %v195_v59 }
  0x63   :  { %v183_v60 = vadd.f32 -0.4999988, %v182_v44  ;;  %v190_v55 = vadd.f32 -0.16666654, %v189_v15  ;;  %v328_v3 = vxor.u32 2147483648, %v327_v49  ;;  %v452_v17 = vadd.s32 %v451_v16, %v441_v42 }
  0x64   :  { %vm527_vm5 = vcmp.gt.s32.totalorder %v526_v54, 0  ;;  %v2148_v56 = vand.u32 3, %v333_v53  ;;  %v454_v20 = vmul.u32 %v2038_v26, %v400_v14  ;;  %vm456_vm6 = vc.u32 %v2129_v31, %v2131_v61 }
  0x65   :  { %v184_v62 = vmul.f32 %v183_v60, %v179_v13  ;;  %v191_v27 = vmul.f32 %v190_v55, %v179_v13  ;;  %v329_v32 = vsel %vm208_vm14, %v328_v3, %v327_v49  ;;  %v453_v5 = vadd.s32 %v452_v17, %v443_v43 }
  0x66   :  { %v2138_v10 = vsel %vm2106_vm1, %v1856_v2, %v329_v32  ;;  %v528_v1 = vsel %vm527_vm5, %v526_v54, 0  ;;  %v523_v50 = vand.u32 8388607, %v516_v11  ;;  %vm197_vm7 = vcmp.lt.s32.totalorder %v2144_v22, 2 }
  0x67   :  { %v192_v4 = vadd.f32 1.0, %v191_v27  ;;  %v334_v13 = vmul.f32 %v2138_v10, %v2138_v10  ;;  %v185_v52 = vadd.f32 1.0, %v184_v62  ;;  %v457_v59 = vadd.s32 1, %v453_v5 }
  0x68   :  { %v530_v46 = vand.u32 31, %v528_v1  ;;  %vm198_vm8 = vcmp.eq.s32.totalorder %v2144_v22, 0  ;;  %vm201_vm9 = vcmp.eq.s32.totalorder %v2144_v22, 2  ;;  %vm194_vm10 = vweird.f32 %v1868_v12 }
  0x69   :  { %v335_v18 = vmul.f32 -0.001358992, %v334_v13  ;;  %v342_v19 = vmul.f32 -0.00019511016, %v334_v13  ;;  %v193_v25 = vmul.f32 %v192_v4, %v2113_v58  ;;  %v202_v51 = vxor.u32 2147483648, %v185_v52 }
  0x6a   :  { %v458_v24 = vsel %vm456_vm6, %v457_v59, %v453_v5  ;;  %v2158_v37 = vsub.s32 32, %v530_v46  ;;  %vm352_vm11 = vcmp.eq.s32.totalorder %v2148_v56, 0  ;;  %vm355_vm12 = vcmp.eq.s32.totalorder %v2148_v56, 2 }
  0x6b   :  { %v336_v63 = vadd.f32 0.041655596, %v335_v18  ;;  %v343_v47 = vadd.f32 0.008332121, %v342_v19  ;;  %v459_v58 = vadd.s32 %v458_v24, %v454_v20  ;;  %v199_v7 = vxor.u32 2147483648, %v193_v25 }
  0x6c   :  { %v524_v8 = vor.u32 8388608, %v523_v50  ;;  %v2164_v38 = vshrl.u32 %v528_v1, 5  ;;  %vm351_vm13 = vcmp.lt.s32.totalorder %v2148_v56, 2  ;;  %v533_v15 = vshll.u32 %v1833_v34, %v530_v46 }
  0x6d   :  { %v337_v26 = vmul.f32 %v336_v63, %v334_v13  ;;  %v344_v21 = vmul.f32 %v343_v47, %v334_v13  ;;  %v460_v44 = vadd.s32 536870912, %v459_v58  ;;  %v203_v49 = vsel %vm201_vm9, %v202_v51, %v193_v25 }
  0x6e   :  { %vm349_vm14 = vweird.f32 %v1856_v2  ;;  %v534_v28 = vshrl.u32 %v1834_v36, %v2158_v37  ;;  %v536_v53 = vshll.u32 %v1834_v36, %v530_v46  ;;  %v537_v42 = vshrl.u32 %v1835_v39, %v2158_v37 }
  0x6f   :  { %v338_v40 = vadd.f32 -0.4999988, %v337_v26  ;;  %v345_v41 = vadd.f32 -0.16666654, %v344_v21  ;;  %v2174_v55 = vshrl.u32 %v460_v44, 30  ;;  %v542_v3 = vshll.u32 %v1836_v45, %v530_v46 }
  0x70   :  { %v200_v30 = vsel %vm198_vm8, %v185_v52, %v199_v7  ;;  %v539_v43 = vshll.u32 %v1835_v39, %v530_v46  ;;  %v540_v16 = vshrl.u32 %v1836_v45, %v2158_v37  ;;  %v543_v62 = vshrl.u32 %v1837_v48, %v2158_v37 }
  0x71   :  { %v339_v35 = vmul.f32 %v338_v40, %v334_v13  ;;  %v346_v60 = vmul.f32 %v345_v41, %v334_v13  ;;  %v462_v54 = vshll.u32 %v2174_v55, 30  ;;  %v2185_v14 = vor.u32 %v534_v28, %v533_v15 }
  0x72   :  { %v2187_v17 = vor.u32 %v537_v42, %v536_v53  ;;  %v544_v4 = vor.u32 %v543_v62, %v542_v3  ;;  %v545_v13 = vshll.u32 %v1837_v48, %v530_v46  ;;  %v546_v52 = vshrl.u32 %v1838_v9, %v2158_v37 }
  0x73   :  { %v340_v27 = vadd.f32 1.0, %v339_v35  ;;  %v347_v32 = vadd.f32 1.0, %v346_v60  ;;  %v463_v18 = vsub.s32 %v459_v58, %v462_v54  ;;  %vm548_vm15 = vcmp.lt.s32.totalorder %v2164_v38, 1 }
  0x74   :  { %v204_v19 = vsel %vm197_vm7, %v200_v30, %v203_v49  ;;  %v541_v20 = vor.u32 %v540_v16, %v539_v43  ;;  %v547_v25 = vor.u32 %v546_v52, %v545_v13  ;;  %vm550_vm0 = vcmp.lt.s32.totalorder %v2164_v38, 3 }
  0x75   :  { %v348_v5 = vmul.f32 %v347_v32, %v2138_v10  ;;  %v356_v1 = vxor.u32 2147483648, %v340_v27  ;;  %vm464_vm1 = vcmp.lt.s32.totalorder %v463_v18, 0  ;;  %v465_v46 = vsub.s32 0, %v463_v18 }
  0x76   :  { %vm549_vm2 = vcmp.lt.s32.totalorder %v2164_v38, 2  ;;  %vm551_vm3 = vcmp.lt.s32.totalorder %v2164_v38, 4  ;;  %v556_v10 = vsel %vm548_vm15, %v2185_v14, %v2187_v17  ;;  %v2205_v22 = vshll.u32 %v524_v8, 8 }
  0x77   :  { %v353_v59 = vxor.u32 2147483648, %v348_v5  ;;  %v357_v50 = vsel %vm355_vm12, %v356_v1, %v348_v5  ;;  %v2209_v63 = vsel %vm194_vm10, nan, %v204_v19  ;;  %v466_v51 = vsel %vm464_vm1, %v465_v46, %v463_v18 }
  0x78   :  { %v557_v24 = vsel %vm551_vm3, %v544_v4, 920167782  ;;  %v467_v21 = vclz %v466_v51  ;;  %v560_v12 = vsel %vm548_vm15, %v2187_v17, %v541_v20  ;;  %v561_v40 = vsel %vm551_vm3, %v547_v25, 1326507024 }
  0x79   :  { %v354_v47 = vsel %vm352_vm11, %v340_v27, %v353_v59  ;;  %v558_v58 = vsel %vm550_vm0, %v541_v20, %v557_v24  ;;  %v562_v44 = vsel %vm550_vm0, %v544_v4, %v561_v40  ;;  %v455_v15 = vadd.s32 %v2131_v61, %v2129_v31 }
  0x7a   :  { %v358_v26 = vsel %vm351_vm13, %v354_v47, %v357_v50  ;;  %v559_v8 = vsel %vm549_vm2, %v556_v10, %v558_v58  ;;  %v1743_v41 = vadd.s32 4294967294, %v467_v21  ;;  %v563_v2 = vsel %vm549_vm2, %v560_v12, %v562_v44 }
  0x7b   :  { %v2224_v7 = vsel %vm349_vm14, nan, %v358_v26  ;;  %v565_v49 = vand.u32 65535, %v2205_v22  ;;  %v590_v28 = vshrl.u32 %v559_v8, 16  ;;  %v566_v53 = vshrl.u32 %v2205_v22, 16 }
  0x7c   :  { %v2232_v56 = vmul.f32 %v2224_v7, %v2209_v63  ;;  %vm1744_vm4 = vcmp.lt.s32.totalorder %v1743_v41, 0  ;;  %v567_v42 = vand.u32 65535, %v563_v2  ;;  %v568_v35 = vshrl.u32 %v563_v2, 16 }
  0x7d   :  { %v470_v60 = vsel %vm1744_vm4, 0, %v1743_v41  ;;  %v589_v3 = vand.u32 65535, %v559_v8  ;;  %v674_v43 = vand.u32 2139095040, %v1861_v6  ;;  %v532_v16 = vshrl.u32 %v1833_v34, %v2158_v37 }
  0x7e   :  { %1754 = vst [vmem:[%s3216_s1 + $0x2] sm:$0x1] %v2232_v56  ;;  %v471_v30 = vsub.s32 32, %v470_v60  ;;  %v472_v31 = vshll.u32 %v463_v18, %v470_v60  ;;  %v475_v61 = vsub.s32 4294967266, %v470_v60  ;;  %v569_v62 = vmul.u32 %v567_v42, %v565_v49 }
  0x7f   :  { %v570_v27 = vmul.u32 %v568_v35, %v565_v49  ;;  %v592_v32 = vmul.u32 %v590_v28, %v565_v49  ;;  %v485_v13 = vsub.s32 4, %v2174_v55  ;;  %v571_v52 = vmul.u32 %v567_v42, %v566_v53 }
  0x80   :  { %v473_v54 = vshrl.u32 %v455_v15, %v471_v30  ;;  %v476_v4 = vadd.s32 127, %v475_v61  ;;  %vm363_vm5 = vcmp.lt.s32.totalorder %v1854_v0, 0  ;;  %v572_v5 = vmul.u32 %v568_v35, %v566_v53 }
  0x81   :  { %v573_v1 = vshll.u32 %v570_v27, 16  ;;  %v591_v19 = vmul.u32 %v589_v3, %v565_v49  ;;  %v593_v18 = vmul.u32 %v589_v3, %v566_v53  ;;  %v553_v50 = vsel %vm551_vm3, %v541_v20, 2102212464 }
  0x82   :  { %v474_v25 = vor.u32 %v473_v54, %v472_v31  ;;  %v477_v59 = vshll.u32 %v476_v4, 23  ;;  %v575_v37 = vshll.u32 %v571_v52, 16  ;;  %v594_v10 = vmul.u32 %v590_v28, %v566_v53  ;;  %v2280_v4 = vld [vmem:[#allocation2] sm:$0x1] }
  0x83   :  { %vm577_vm6 = vc.u32 %v569_v62, %v573_v1  ;;  %v579_v46 = vadd.s32 %v573_v1, %v569_v62  ;;  %v595_v47 = vshll.u32 %v592_v32, 16  ;;  %v597_v21 = vshll.u32 %v593_v18, 16 }
  0x84   :  { %v478_v51 = vor.u32 4788187, %v477_v59  ;;  %v481_v24 = vcvt.s32.f32 %v474_v25  ;;  %v578_v26 = vsel %vm577_vm6, 1, %v1839_v23  ;;  %v574_v58 = vshrl.u32 %v570_v27, 16 }
  0x85   :  { %v580_v12 = vadd.s32 %v578_v26, %v572_v5  ;;  %vm581_vm7 = vc.u32 %v579_v46, %v575_v37  ;;  %vm599_vm8 = vc.u32 %v591_v19, %v595_v47  ;;  %v601_v20 = vadd.s32 %v595_v47, %v591_v19 }
  0x86   :  { %v479_v8 = vand.u32 2147483647, %v478_v51  ;;  %v582_v40 = vsel %vm581_vm7, 1, %v1839_v23  ;;  %v600_v41 = vsel %vm599_vm8, 1, %v1839_v23  ;;  %v576_v44 = vshrl.u32 %v571_v52, 16 }
  0x87   :  { %v584_v15 = vadd.s32 %v582_v40, %v580_v12  ;;  %v602_v2 = vadd.s32 %v600_v41, %v594_v10  ;;  %v675_v49 = vshrl.u32 %v674_v43, 23  ;;  %v552_v53 = vsel %vm548_vm15, %v532_v16, %v2185_v14 }
  0x88   :  { %v482_v28 = vmul.f32 %v481_v24, %v479_v8  ;;  %v596_v42 = vshrl.u32 %v592_v32, 16  ;;  %vm603_vm9 = vc.u32 %v601_v20, %v597_v21  ;;  %v554_v35 = vsel %vm550_vm0, %v2187_v17, %v553_v50  ;;  %v2295_v50 = vld [vmem:[#allocation2 + $0x1] sm:$0x1] }
  0x89   :  { %v585_v60 = vadd.s32 %v584_v15, %v574_v58  ;;  %v604_v3 = vsel %vm603_vm9, 1, %v1839_v23  ;;  %v1748_v30 = vadd.s32 4294967169, %v675_v49  ;;  %vm2265_vm10 = vcmp.le.f32.partialorder %v361_v29, 0.7853982 }
  0x8a   :  { %v483_v61 = vxor.u32 2147483648, %v482_v28  ;;  %v598_v43 = vshrl.u32 %v593_v18, 16  ;;  %v606_v62 = vadd.s32 %v604_v3, %v602_v2  ;;  %v486_v14 = vsel %vm363_vm5, %v485_v13, %v2174_v55 }
  0x8b   :  { %v2272_v16 = vadd.s32 %v585_v60, %v576_v44  ;;  %v2274_v17 = vadd.s32 %v601_v20, %v597_v21  ;;  %v681_v27 = vadd.s32 1, %v1748_v30  ;;  %v555_v29 = vsel %vm549_vm2, %v552_v53, %v554_v35 }
  0x8c   :  { %v484_v32 = vsel %vm363_vm5, %v483_v61, %v482_v28  ;;  %v607_v54 = vadd.s32 %v606_v62, %v596_v42  ;;  %v671_v55 = vand.u32 2147483647, %v1861_v6  ;;  %v488_v13 = vsel %vm2265_vm10, 0, %v486_v14 }
  0x8d   :  { %v2285_v52 = vsel %vm2265_vm10, %v2280_v4, %v484_v32  ;;  %vm682_vm11 = vcmp.gt.s32.totalorder %v681_v27, 0  ;;  %v609_v1 = vmul.u32 %v2205_v22, %v555_v29  ;;  %vm611_vm12 = vc.u32 %v2272_v16, %v2274_v17 }
  0x8e   :  { %v489_v0 = vmul.f32 %v2285_v52, %v2285_v52  ;;  %v608_v5 = vadd.s32 %v607_v54, %v598_v43  ;;  %v683_v38 = vsel %vm682_vm11, %v681_v27, 0  ;;  %v2299_v37 = vadd.f32 %v2295_v50, %v1861_v6 }
  0x8f   :  { %v685_v19 = vand.u32 31, %v683_v38  ;;  %v505_v46 = vadd.s32 3, %v488_v13  ;;  %v678_v22 = vand.u32 8388607, %v671_v55  ;;  %v827_v12 = vand.u32 2147483647, %v2008_v57 }
  0x90   :  { %v490_v18 = vmul.f32 -0.001358992, %v489_v0  ;;  %v497_v25 = vmul.f32 -0.00019511016, %v489_v0  ;;  %v612_v59 = vadd.s32 1, %v608_v5  ;;  %v2308_v15 = vshrl.u32 %v683_v38, 5 }
  0x91   :  { %v686_v10 = vsub.s32 32, %v685_v19  ;;  %v688_v21 = vshll.u32 %v1833_v34, %v685_v19  ;;  %v691_v58 = vshll.u32 %v1834_v36, %v685_v19  ;;  %v697_v2 = vshll.u32 %v1836_v45, %v685_v19 }
  0x92   :  { %v491_v47 = vadd.f32 0.041655596, %v490_v18  ;;  %v498_v51 = vadd.f32 0.008332121, %v497_v25  ;;  %v613_v24 = vsel %vm611_vm12, %v612_v59, %v608_v5  ;;  %v679_v28 = vor.u32 8388608, %v678_v22 }
  0x93   :  { %v614_v26 = vadd.s32 %v613_v24, %v609_v1  ;;  %v689_v41 = vshrl.u32 %v1834_v36, %v686_v10  ;;  %v692_v20 = vshrl.u32 %v1835_v39, %v686_v10  ;;  %v698_v49 = vshrl.u32 %v1837_v48, %v686_v10 }
  0x94   :  { %v492_v8 = vmul.f32 %v491_v47, %v489_v0  ;;  %v499_v40 = vmul.f32 %v498_v51, %v489_v0  ;;  %v694_v53 = vshll.u32 %v1835_v39, %v685_v19  ;;  %v695_v42 = vshrl.u32 %v1836_v45, %v686_v10 }
  0x95   :  { %v615_v44 = vadd.s32 536870912, %v614_v26  ;;  %v830_v35 = vand.u32 2139095040, %v2008_v57  ;;  %v700_v30 = vshll.u32 %v1837_v48, %v685_v19  ;;  %v701_v31 = vshrl.u32 %v1838_v9, %v686_v10 }
  0x96   :  { %v500_v60 = vadd.f32 -0.16666654, %v499_v40  ;;  %v493_v61 = vadd.f32 -0.4999988, %v492_v8  ;;  %vm518_vm13 = vcmp.lt.s32.totalorder %v2032_v33, 0  ;;  %v690_v43 = vor.u32 %v689_v41, %v688_v21 }
  0x97   :  { %v616_v3 = vshrl.u32 %v615_v44, 30  ;;  %v693_v62 = vor.u32 %v692_v20, %v691_v58  ;;  %v2320_v14 = vand.u32 8388607, %v827_v12  ;;  %v2322_v27 = vand.u32 3, %v505_v46 }
  0x98   :  { %v699_v29 = vor.u32 %v698_v49, %v697_v2  ;;  %vm703_vm14 = vcmp.lt.s32.totalorder %v2308_v15, 1  ;;  %v696_v54 = vor.u32 %v695_v42, %v694_v53  ;;  %vm706_vm15 = vcmp.lt.s32.totalorder %v2308_v15, 4 }
  0x99   :  { %v617_v32 = vshll.u32 %v616_v3, 30  ;;  %v2326_v13 = vshll.u32 %v679_v28, 8  ;;  %v831_v5 = vshrl.u32 %v830_v35, 23  ;;  %v501_v38 = vmul.f32 %v500_v60, %v489_v0 }
  0x9a   :  { %vm2330_vm0 = vcmp.le.f32.partialorder %v516_v11, 0.7853982  ;;  %v702_v18 = vor.u32 %v701_v31, %v700_v30  ;;  %vm705_vm1 = vcmp.lt.s32.totalorder %v2308_v15, 3  ;;  %v494_v25 = vmul.f32 %v493_v61, %v489_v0 }
  0x9b   :  { %v618_v19 = vsub.s32 %v614_v26, %v617_v32  ;;  %vm704_vm2 = vcmp.lt.s32.totalorder %v2308_v15, 2  ;;  %v711_v59 = vsel %vm703_vm14, %v690_v43, %v693_v62  ;;  %v835_v46 = vor.u32 8388608, %v2320_v14 }
  0x9c   :  { %v640_v51 = vsub.s32 4, %v616_v3  ;;  %v712_v11 = vsel %vm706_vm15, %v699_v29, 920167782  ;;  %v610_v24 = vadd.s32 %v2274_v17, %v2272_v16  ;;  %v687_v22 = vshrl.u32 %v1833_v34, %v686_v10 }
  0x9d   :  { %vm619_vm3 = vcmp.lt.s32.totalorder %v618_v19, 0  ;;  %v620_v47 = vsub.s32 0, %v618_v19  ;;  %v713_v0 = vsel %vm705_vm1, %v696_v54, %v712_v11  ;;  %v715_v26 = vsel %vm703_vm14, %v693_v62, %v696_v54 }
  0x9e   :  { %v502_v21 = vadd.f32 1.0, %v501_v38  ;;  %v714_v8 = vsel %vm704_vm2, %v711_v59, %v713_v0  ;;  %v716_v40 = vsel %vm706_vm15, %v702_v18, 1326507024  ;;  %v2352_v41 = vadd.f32 1.0, %v494_v25 }
  0x9f   :  { %v621_v58 = vsel %vm619_vm3, %v620_v47, %v618_v19  ;;  %v717_v16 = vsel %vm705_vm1, %v699_v29, %v716_v40  ;;  %v720_v17 = vand.u32 65535, %v2326_v13  ;;  %v2359_v10 = vsel %vm518_vm13, %v640_v51, %v616_v3 }
  0xa0   :  { %v622_v20 = vclz %v621_v58  ;;  %v718_v44 = vsel %vm704_vm2, %v715_v26, %v717_v16  ;;  %v721_v2 = vshrl.u32 %v2326_v13, 16  ;;  %v745_v49 = vshrl.u32 %v714_v8, 16 }
  0xa1   :  { %v722_v53 = vand.u32 65535, %v718_v44  ;;  %v723_v42 = vshrl.u32 %v718_v44, 16  ;;  %v1751_v35 = vadd.s32 4294967169, %v831_v5  ;;  %v2365_v60 = vmul.f32 %v502_v21, %v2285_v52 }
  0xa2   :  { %v1746_v28 = vadd.s32 4294967294, %v622_v20  ;;  %v707_v30 = vsel %vm703_vm14, %v687_v22, %v690_v43  ;;  %v708_v3 = vsel %vm706_vm15, %v696_v54, 2102212464  ;;  %v744_v31 = vand.u32 65535, %v714_v8 }
  0xa3   :  { %v512_v61 = vxor.u32 2147483648, %v2352_v41  ;;  %v643_v32 = vsel %vm2330_vm0, 0, %v2359_v10  ;;  %v747_v29 = vmul.u32 %v745_v49, %v720_v17  ;;  %vm511_vm5 = vcmp.eq.s32.totalorder %v2322_v27, 2 }
  0xa4   :  { %vm1747_vm4 = vcmp.lt.s32.totalorder %v1746_v28, 0  ;;  %v724_v52 = vmul.u32 %v722_v53, %v720_v17  ;;  %v725_v38 = vmul.u32 %v723_v42, %v720_v17  ;;  %v726_v18 = vmul.u32 %v722_v53, %v721_v2 }
  0xa5   :  { %v625_v5 = vsel %vm1747_vm4, 0, %v1746_v28  ;;  %v709_v54 = vsel %vm705_vm1, %v693_v62, %v708_v3  ;;  %v727_v47 = vmul.u32 %v723_v42, %v721_v2  ;;  %v746_v11 = vmul.u32 %v744_v31, %v720_v17 }
  0xa6   :  { %v626_v25 = vsub.s32 32, %v625_v5  ;;  %v627_v43 = vshll.u32 %v618_v19, %v625_v5  ;;  %v630_v59 = vsub.s32 4294967266, %v625_v5  ;;  %v728_v51 = vshll.u32 %v725_v38, 16 }
  0xa7   :  { %v748_v22 = vmul.u32 %v744_v31, %v721_v2  ;;  %vm508_vm6 = vcmp.eq.s32.totalorder %v2322_v27, 0  ;;  %v730_v21 = vshll.u32 %v726_v18, 16  ;;  %v837_v58 = vadd.s32 1, %v1751_v35 }
  0xa8   :  { %v628_v0 = vshrl.u32 %v610_v24, %v626_v25  ;;  %v631_v26 = vadd.s32 127, %v630_v59  ;;  %vm732_vm7 = vc.u32 %v724_v52, %v728_v51  ;;  %v734_v8 = vadd.s32 %v728_v51, %v724_v52 }
  0xa9   :  { %v749_v40 = vmul.u32 %v745_v49, %v721_v2  ;;  %v750_v20 = vshll.u32 %v747_v29, 16  ;;  %v729_v44 = vshrl.u32 %v725_v38, 16  ;;  %v733_v28 = vsel %vm732_vm7, 1, %v1839_v23 }
  0xaa   :  { %v629_v16 = vor.u32 %v628_v0, %v627_v43  ;;  %v632_v19 = vshll.u32 %v631_v26, 23  ;;  %v735_v62 = vadd.s32 %v733_v28, %v727_v47  ;;  %vm736_vm8 = vc.u32 %v734_v8, %v730_v21 }
  0xab   :  { %v752_v53 = vshll.u32 %v748_v22, 16  ;;  %vm754_vm9 = vc.u32 %v746_v11, %v750_v20  ;;  %v737_v24 = vsel %vm736_vm8, 1, %v1839_v23  ;;  %v756_v31 = vadd.s32 %v750_v20, %v746_v11 }
  0xac   :  { %v633_v17 = vor.u32 4788187, %v632_v19  ;;  %v636_v42 = vcvt.s32.f32 %v629_v16  ;;  %v755_v3 = vsel %vm754_vm9, 1, %v1839_v23  ;;  %v739_v35 = vadd.s32 %v737_v24, %v735_v62 }
  0xad   :  { %v757_v5 = vadd.s32 %v755_v3, %v749_v40  ;;  %vm838_vm10 = vcmp.gt.s32.totalorder %v837_v58, 0  ;;  %v710_v49 = vsel %vm704_vm2, %v707_v30, %v709_v54  ;;  %v731_v52 = vshrl.u32 %v726_v18, 16 }
  0xae   :  { %v634_v2 = vand.u32 2147483647, %v633_v17  ;;  %v839_v38 = vsel %vm838_vm10, %v837_v58, 0  ;;  %v509_v25 = vxor.u32 2147483648, %v2365_v60  ;;  %v740_v43 = vadd.s32 %v739_v35, %v729_v44 }
  0xaf   :  { %v751_v59 = vshrl.u32 %v747_v29, 16  ;;  %vm758_vm11 = vc.u32 %v756_v31, %v752_v53  ;;  %v513_v47 = vsel %vm511_vm5, %v512_v61, %v2365_v60  ;;  %v841_v0 = vand.u32 31, %v839_v38 }
  0xb0   :  { %v637_v51 = vmul.f32 %v636_v42, %v634_v2  ;;  %v759_v11 = vsel %vm758_vm11, 1, %v1839_v23  ;;  %vm507_vm12 = vcmp.lt.s32.totalorder %v2322_v27, 2  ;;  %v753_v26 = vshrl.u32 %v748_v22, 16 }
  0xb1   :  { %v2390_v15 = vadd.s32 %v756_v31, %v752_v53  ;;  %v761_v30 = vadd.s32 %v759_v11, %v757_v5  ;;  %v764_v18 = vmul.u32 %v2326_v13, %v710_v49  ;;  %v2393_v21 = vadd.s32 %v740_v43, %v731_v52 }
  0xb2   :  { %v638_v54 = vxor.u32 2147483648, %v637_v51  ;;  %v2395_v29 = vsub.s32 32, %v841_v0  ;;  %v844_v58 = vshll.u32 %v1833_v34, %v841_v0  ;;  %v510_v60 = vsel %vm508_vm6, %v2352_v41, %v509_v25 }
  0xb3   :  { %v762_v61 = vadd.s32 %v761_v30, %v751_v59  ;;  %v2401_v8 = vshrl.u32 %v839_v38, 5  ;;  %v847_v22 = vshll.u32 %v1834_v36, %v841_v0  ;;  %v850_v16 = vshll.u32 %v1835_v39, %v841_v0 }
  0xb4   :  { %v639_v40 = vsel %vm518_vm13, %v638_v54, %v637_v51  ;;  %v845_v13 = vshrl.u32 %v1834_v36, %v2395_v29  ;;  %v848_v20 = vshrl.u32 %v1835_v39, %v2395_v29  ;;  %vm504_vm14 = vweird.f32 %v2280_v4 }
  0xb5   :  { %v642_v41 = vsel %vm2330_vm0, %v2032_v33, %v639_v40  ;;  %v763_v19 = vadd.s32 %v762_v61, %v753_v26  ;;  %v851_v44 = vshrl.u32 %v1836_v45, %v2395_v29  ;;  %v853_v28 = vshll.u32 %v1836_v45, %v841_v0 }
  0xb6   :  { %v644_v62 = vmul.f32 %v642_v41, %v642_v41  ;;  %vm766_vm13 = vc.u32 %v2393_v21, %v2390_v15  ;;  %v2420_v53 = vor.u32 %v845_v13, %v844_v58  ;;  %v854_v17 = vshrl.u32 %v1837_v48, %v2395_v29 }
  0xb7   :  { %v767_v42 = vadd.s32 1, %v763_v19  ;;  %v2424_v24 = vor.u32 %v848_v20, %v847_v22  ;;  %v856_v3 = vshll.u32 %v1837_v48, %v841_v0  ;;  %v857_v35 = vshrl.u32 %v1838_v9, %v2395_v29 }
  0xb8   :  { %v645_v31 = vmul.f32 -0.001358992, %v644_v62  ;;  %v652_v5 = vmul.f32 -0.00019511016, %v644_v62  ;;  %v855_v2 = vor.u32 %v854_v17, %v853_v28  ;;  %vm859_vm15 = vcmp.lt.s32.totalorder %v2401_v8, 1 }
  0xb9   :  { %v768_v49 = vsel %vm766_vm13, %v767_v42, %v763_v19  ;;  %v2430_v52 = vor.u32 %v851_v44, %v850_v16  ;;  %v858_v38 = vor.u32 %v857_v35, %v856_v3  ;;  %vm862_vm1 = vcmp.lt.s32.totalorder %v2401_v8, 4 }
  0xba   :  { %v646_v25 = vadd.f32 0.041655596, %v645_v31  ;;  %v653_v43 = vadd.f32 0.008332121, %v652_v5  ;;  %v769_v59 = vadd.s32 %v768_v49, %v764_v18  ;;  %vm861_vm2 = vcmp.lt.s32.totalorder %v2401_v8, 3 }
  0xbb   :  { %vm860_vm3 = vcmp.lt.s32.totalorder %v2401_v8, 2  ;;  %v867_v51 = vsel %vm859_vm15, %v2420_v53, %v2424_v24  ;;  %v868_v11 = vsel %vm862_vm1, %v855_v2, 920167782  ;;  %v2443_v0 = vshll.u32 %v835_v46, 8 }
  0xbc   :  { %v514_v26 = vsel %vm507_vm12, %v510_v60, %v513_v47  ;;  %v647_v30 = vmul.f32 %v646_v25, %v644_v62  ;;  %v654_v18 = vmul.f32 %v653_v43, %v644_v62  ;;  %v770_v54 = vadd.s32 536870912, %v769_v59 }
  0xbd   :  { %v660_v58 = vand.u32 3, %v643_v32  ;;  %v869_v61 = vsel %vm861_vm2, %v2430_v52, %v868_v11  ;;  %v871_v14 = vsel %vm859_vm15, %v2424_v24, %v2430_v52  ;;  %v872_v27 = vsel %vm862_vm1, %v858_v38, 1326507024 }
  0xbe   :  { %v648_v46 = vadd.f32 -0.4999988, %v647_v30  ;;  %v655_v47 = vadd.f32 -0.16666654, %v654_v18  ;;  %v2460_v60 = vshrl.u32 %v770_v54, 30  ;;  %v870_v1 = vsel %vm860_vm3, %v867_v51, %v869_v61 }
  0xbf   :  { %v2465_v10 = vmul.f32 0.5, %v2299_v37  ;;  %v873_v32 = vsel %vm861_vm2, %v855_v2, %v872_v27  ;;  %v876_v22 = vand.u32 65535, %v2443_v0  ;;  %v901_v40 = vshrl.u32 %v870_v1, 16 }
  0xc0   :  { %v2472_v13 = vsel %vm504_vm14, nan, %v514_v26  ;;  %v649_v20 = vmul.f32 %v648_v46, %v644_v62  ;;  %v656_v16 = vmul.f32 %v655_v47, %v644_v62  ;;  %v772_v19 = vshll.u32 %v2460_v60, 30 }
  0xc1   :  { %vm659_vm0 = vweird.f32 %v2032_v33  ;;  %vm661_vm4 = vcmp.lt.s32.totalorder %v660_v58, 2  ;;  %v874_v37 = vsel %vm860_vm3, %v871_v14, %v873_v32  ;;  %v877_v44 = vshrl.u32 %v2443_v0, 16 }
  0xc2   :  { %v650_v28 = vadd.f32 1.0, %v649_v20  ;;  %v657_v17 = vadd.f32 1.0, %v656_v16  ;;  %vm665_vm5 = vcmp.eq.s32.totalorder %v660_v58, 2  ;;  %v773_v42 = vsub.s32 %v769_v59, %v772_v19 }
  0xc3   :  { %v878_v3 = vand.u32 65535, %v874_v37  ;;  %v879_v35 = vshrl.u32 %v874_v37, 16  ;;  %v900_v31 = vand.u32 65535, %v870_v1  ;;  %v2479_v5 = vmul.u32 %v901_v40, %v876_v22 }
  0xc4   :  { %v658_v62 = vmul.f32 %v657_v17, %v642_v41  ;;  %v666_v2 = vxor.u32 2147483648, %v650_v28  ;;  %vm774_vm6 = vcmp.lt.s32.totalorder %v773_v42, 0  ;;  %v775_v49 = vsub.s32 0, %v773_v42 }
  0xc5   :  { %vm662_vm7 = vcmp.eq.s32.totalorder %v660_v58, 0  ;;  %v880_v38 = vmul.u32 %v878_v3, %v876_v22  ;;  %v881_v25 = vmul.u32 %v879_v35, %v876_v22  ;;  %v882_v43 = vmul.u32 %v878_v3, %v877_v44 }
  0xc6   :  { %v663_v51 = vxor.u32 2147483648, %v658_v62  ;;  %v667_v11 = vsel %vm665_vm5, %v666_v2, %v658_v62  ;;  %v765_v26 = vadd.s32 %v2390_v15, %v2393_v21  ;;  %v776_v30 = vsel %vm774_vm6, %v775_v49, %v773_v42 }
  0xc7   :  { %v777_v59 = vclz %v776_v30  ;;  %v883_v18 = vmul.u32 %v879_v35, %v877_v44  ;;  %v884_v54 = vshll.u32 %v881_v25, 16  ;;  %v902_v61 = vmul.u32 %v900_v31, %v876_v22 }
  0xc8   :  { %v664_v14 = vsel %vm662_vm7, %v650_v28, %v663_v51  ;;  %v886_v27 = vshll.u32 %v882_v43, 16  ;;  %v2483_v41 = vmul.u32 %v900_v31, %v877_v44  ;;  %v906_v46 = vshll.u32 %v2479_v5, 16 }
  0xc9   :  { %v668_v47 = vsel %vm661_vm4, %v664_v14, %v667_v11  ;;  %vm673_vm8 = vcmp.lt.s32.totalorder %v1861_v6, 0  ;;  %v1749_v1 = vadd.s32 4294967294, %v777_v59  ;;  %vm888_vm9 = vc.u32 %v880_v38, %v884_v54 }
  0xca   :  { %v890_v32 = vadd.s32 %v884_v54, %v880_v38  ;;  %v2490_v15 = vsel %vm659_vm0, nan, %v668_v47  ;;  %v843_v21 = vshrl.u32 %v1833_v34, %v2395_v29  ;;  %v889_v22 = vsel %vm888_vm9, 1, %v1839_v23 }
  0xcb   :  { %v905_v20 = vmul.u32 %v901_v40, %v877_v44  ;;  %v2497_v16 = vmul.f32 %v2490_v15, %v2472_v13  ;;  %vm1750_vm10 = vcmp.lt.s32.totalorder %v1749_v1, 0  ;;  %v885_v58 = vshrl.u32 %v881_v25, 16 }
  0xcc   :  { %v891_v19 = vadd.s32 %v889_v22, %v883_v18  ;;  %v780_v37 = vsel %vm1750_vm10, 0, %v1749_v1  ;;  %vm892_vm11 = vc.u32 %v890_v32, %v886_v27  ;;  %v908_v28 = vshll.u32 %v2483_v41, 16 }
  0xcd   :  { %vm910_vm12 = vc.u32 %v902_v61, %v906_v46  ;;  %v781_v33 = vsub.s32 32, %v780_v37  ;;  %v782_v17 = vshll.u32 %v773_v42, %v780_v37  ;;  %v785_v3 = vsub.s32 4294967266, %v780_v37  ;;  %1755 = vst [vmem:[%s3216_s1 + $0x3] sm:$0x1] %v2497_v16 }
  0xce   :  { %v893_v29 = vsel %vm892_vm11, 1, %v1839_v23  ;;  %v795_v40 = vsub.s32 4, %v2460_v60  ;;  %v863_v44 = vsel %vm859_vm15, %v843_v21, %v2420_v53  ;;  %v864_v35 = vsel %vm862_vm1, %v2430_v52, 2102212464 }
  0xcf   :  { %v895_v31 = vadd.s32 %v893_v29, %v891_v19  ;;  %v783_v42 = vshrl.u32 %v765_v26, %v781_v33  ;;  %v786_v62 = vadd.s32 127, %v785_v3  ;;  %v911_v2 = vsel %vm910_vm12, 1, %v1839_v23 }
  0xd0   :  { %v912_v49 = vadd.s32 %v906_v46, %v902_v61  ;;  %v887_v38 = vshrl.u32 %v882_v43, 16  ;;  %v913_v51 = vadd.s32 %v911_v2, %v905_v20  ;;  %v1015_v11 = vand.u32 2139095040, %v2465_v10  ;;  %v1800_v20 = vld [vmem:[#allocation2 + $0x2] sm:$0x1] }
  0xd1   :  { %v896_v25 = vadd.s32 %v895_v31, %v885_v58  ;;  %v784_v30 = vor.u32 %v783_v42, %v782_v17  ;;  %v787_v59 = vshll.u32 %v786_v62, 23  ;;  %v907_v18 = vshrl.u32 %v2479_v5, 16  ;;  %v2541_v58 = vld [vmem:[#allocation2 + $0x3] sm:$0x1] }
  0xd2   :  { %vm914_vm14 = vc.u32 %v912_v49, %v908_v28  ;;  %v796_v53 = vsel %vm673_vm8, %v795_v40, %v2460_v60  ;;  %v865_v52 = vsel %vm861_vm2, %v2424_v24, %v864_v35  ;;  %v1016_v43 = vshrl.u32 %v1015_v11, 23 }
  0xd3   :  { %v915_v26 = vsel %vm914_vm14, 1, %v1839_v23  ;;  %v788_v54 = vor.u32 4788187, %v787_v59  ;;  %v791_v61 = vcvt.s32.f32 %v784_v30  ;;  %v909_v14 = vshrl.u32 %v2483_v41, 16 }
  0xd4   :  { %v917_v27 = vadd.s32 %v915_v26, %v913_v51  ;;  %v2523_v46 = vadd.s32 %v896_v25, %v887_v38  ;;  %v2525_v5 = vadd.s32 %v912_v49, %v908_v28  ;;  %v1760_v47 = vadd.s32 4294967169, %v1016_v43 }
  0xd5   :  { %vm2529_vm13 = vcmp.le.f32.partialorder %v671_v55, 0.7853982  ;;  %v789_v24 = vand.u32 2147483647, %v788_v54  ;;  %v866_v1 = vsel %vm860_vm3, %v863_v44, %v865_v52  ;;  %v2539_v22 = vsub.f32 %v2295_v50, %v2280_v4 }
  0xd6   :  { %v918_v32 = vadd.s32 %v917_v27, %v907_v18  ;;  %v798_v41 = vsel %vm2529_vm13, 0, %v796_v53  ;;  %v1022_v21 = vadd.s32 1, %v1760_v47  ;;  %v2544_v55 = vsub.f32 %v2541_v58, %v1800_v20 }
  0xd7   :  { %v792_v19 = vmul.f32 %v791_v61, %v789_v24  ;;  %v920_v8 = vmul.u32 %v2443_v0, %v866_v1  ;;  %vm922_vm15 = vc.u32 %v2523_v46, %v2525_v5  ;;  %v1012_v28 = vand.u32 2147483647, %v2465_v10 }
  0xd8   :  { %v919_v37 = vadd.s32 %v918_v32, %v909_v14  ;;  %vm1023_vm1 = vcmp.gt.s32.totalorder %v1022_v21, 0  ;;  %v815_v17 = vadd.s32 3, %v798_v41  ;;  %v2552_v40 = vmul.f32 %v2544_v55, %v2539_v22 }
  0xd9   :  { %v793_v33 = vxor.u32 2147483648, %v792_v19  ;;  %v1024_v3 = vsel %vm1023_vm1, %v1022_v21, 0  ;;  %v1019_v42 = vand.u32 8388607, %v1012_v28  ;;  %v1171_v24 = vand.u32 2139095040, %v2295_v50 }
  0xda   :  { %v923_v4 = vadd.s32 1, %v919_v37  ;;  %v1026_v29 = vand.u32 31, %v1024_v3  ;;  %v2567_v49 = vand.u32 3, %v815_v17  ;;  %v2569_v38 = vshrl.u32 %v1024_v3, 5 }
  0xdb   :  { %v794_v44 = vsel %vm673_vm8, %v793_v33, %v792_v19  ;;  %v1020_v54 = vor.u32 8388608, %v1019_v42  ;;  %vm814_vm7 = vweird.f32 %v1861_v6  ;;  %vm829_vm10 = vcmp.lt.s32.totalorder %v2008_v57, 0 }
  0xdc   :  { %v924_v35 = vsel %vm922_vm15, %v923_v4, %v919_v37  ;;  %v2559_v0 = vsel %vm2529_vm13, %v1861_v6, %v794_v44  ;;  %v2563_v62 = vsub.s32 32, %v1026_v29  ;;  %v1029_v25 = vshll.u32 %v1833_v34, %v1026_v29 }
  0xdd   :  { %v925_v31 = vadd.s32 %v924_v35, %v920_v8  ;;  %v799_v2 = vmul.f32 %v2559_v0, %v2559_v0  ;;  %v1032_v30 = vshll.u32 %v1834_v36, %v1026_v29  ;;  %v1038_v52 = vshll.u32 %v1836_v45, %v1026_v29 }
  0xde   :  { %v1030_v11 = vshrl.u32 %v1834_v36, %v2563_v62  ;;  %v1033_v59 = vshrl.u32 %v1835_v39, %v2563_v62  ;;  %v1039_v26 = vshrl.u32 %v1837_v48, %v2563_v62  ;;  %v1035_v61 = vshll.u32 %v1835_v39, %v1026_v29 }
  0xdf   :  { %v926_v51 = vadd.s32 536870912, %v925_v31  ;;  %v800_v18 = vmul.f32 -0.001358992, %v799_v2  ;;  %v807_v53 = vmul.f32 -0.00019511016, %v799_v2  ;;  %v1036_v14 = vshrl.u32 %v1836_v45, %v2563_v62 }
  0xe0   :  { %v2585_v60 = vor.u32 %v1030_v11, %v1029_v25  ;;  %v2589_v32 = vor.u32 %v1033_v59, %v1032_v30  ;;  %v1041_v41 = vshll.u32 %v1837_v48, %v1026_v29  ;;  %v1042_v21 = vshrl.u32 %v1838_v9, %v2563_v62 }
  0xe1   :  { %v2580_v43 = vshrl.u32 %v926_v51, 30  ;;  %v801_v27 = vadd.f32 0.041655596, %v800_v18  ;;  %v808_v47 = vadd.f32 0.008332121, %v807_v53  ;;  %v1040_v37 = vor.u32 %v1039_v26, %v1038_v52 }
  0xe2   :  { %vm1044_vm2 = vcmp.lt.s32.totalorder %v2569_v38, 1  ;;  %vm818_vm3 = vcmp.eq.s32.totalorder %v2567_v49, 0  ;;  %v2598_v33 = vor.u32 %v1036_v14, %v1035_v61  ;;  %vm1047_vm0 = vcmp.lt.s32.totalorder %v2569_v38, 4 }
  0xe3   :  { %v928_v1 = vshll.u32 %v2580_v43, 30  ;;  %v802_v20 = vmul.f32 %v801_v27, %v799_v2  ;;  %v809_v19 = vmul.f32 %v808_v47, %v799_v2  ;;  %v2601_v17 = vshll.u32 %v1020_v54, 8 }
  0xe4   :  { %vm817_vm4 = vcmp.lt.s32.totalorder %v2567_v49, 2  ;;  %vm1045_vm5 = vcmp.lt.s32.totalorder %v2569_v38, 2  ;;  %vm1046_vm6 = vcmp.lt.s32.totalorder %v2569_v38, 3  ;;  %v1043_v44 = vor.u32 %v1042_v21, %v1041_v41 }
  0xe5   :  { %v2596_v8 = vsub.s32 %v925_v31, %v928_v1  ;;  %v803_v4 = vadd.f32 -0.4999988, %v802_v20  ;;  %v810_v3 = vadd.f32 -0.16666654, %v809_v19  ;;  %v1052_v35 = vsel %vm1044_vm2, %v2585_v60, %v2589_v32 }
  0xe6   :  { %vm821_vm9 = vcmp.eq.s32.totalorder %v2567_v49, 2  ;;  %v1053_v25 = vsel %vm1047_vm0, %v1040_v37, 920167782  ;;  %v1056_v30 = vsel %vm1044_vm2, %v2589_v32, %v2598_v33  ;;  %v1172_v59 = vshrl.u32 %v1171_v24, 23 }
  0xe7   :  { %vm930_vm8 = vcmp.lt.s32.totalorder %v2596_v8, 0  ;;  %v931_v29 = vsub.s32 0, %v2596_v8  ;;  %v804_v31 = vmul.f32 %v803_v4, %v799_v2  ;;  %v811_v42 = vmul.f32 %v810_v3, %v799_v2 }
  0xe8   :  { %v1054_v11 = vsel %vm1046_vm6, %v2598_v33, %v1053_v25  ;;  %v1057_v26 = vsel %vm1047_vm0, %v1043_v44, 1326507024  ;;  %v1061_v54 = vand.u32 65535, %v2601_v17  ;;  %v1168_v14 = vand.u32 2147483647, %v2295_v50 }
  0xe9   :  { %v932_v51 = vsel %vm930_vm8, %v931_v29, %v2596_v8  ;;  %v805_v18 = vadd.f32 1.0, %v804_v31  ;;  %v812_v53 = vadd.f32 1.0, %v811_v42  ;;  %v1055_v52 = vsel %vm1045_vm5, %v1052_v35, %v1054_v11 }
  0xea   :  { %v933_v2 = vclz %v932_v51  ;;  %v1086_v61 = vshrl.u32 %v1055_v52, 16  ;;  %v1058_v1 = vsel %vm1046_vm6, %v1040_v37, %v1057_v26  ;;  %v921_v41 = vadd.s32 %v2525_v5, %v2523_v46 }
  0xeb   :  { %v813_v27 = vmul.f32 %v812_v53, %v2559_v0  ;;  %v822_v47 = vxor.u32 2147483648, %v805_v18  ;;  %v1059_v21 = vsel %vm1045_vm5, %v1056_v30, %v1058_v1  ;;  %v1062_v20 = vshrl.u32 %v2601_v17, 16 }
  0xec   :  { %v1752_v24 = vadd.s32 4294967294, %v933_v2  ;;  %v1763_v19 = vadd.s32 4294967169, %v1172_v59  ;;  %v1085_v3 = vand.u32 65535, %v1055_v52  ;;  %v1063_v44 = vand.u32 65535, %v1059_v21 }
  0xed   :  { %v819_v4 = vxor.u32 2147483648, %v813_v27  ;;  %v823_v0 = vsel %vm821_vm9, %v822_v47, %v813_v27  ;;  %v1064_v35 = vshrl.u32 %v1059_v21, 16  ;;  %v2641_v31 = vmul.u32 %v1086_v61, %v1061_v54 }
  0xee   :  { %vm1753_vm11 = vcmp.lt.s32.totalorder %v1752_v24, 0  ;;  %v951_v51 = vsub.s32 4, %v2580_v43  ;;  %v2651_v11 = vand.u32 8388607, %v1168_v14  ;;  %v1178_v30 = vadd.s32 1, %v1763_v19 }
  0xef   :  { %v936_v29 = vsel %vm1753_vm11, 0, %v1752_v24  ;;  %v820_v46 = vsel %vm818_vm3, %v805_v18, %v819_v4  ;;  %v1066_v2 = vmul.u32 %v1064_v35, %v1061_v54  ;;  %v1067_v52 = vmul.u32 %v1063_v44, %v1062_v20 }
  0xf0   :  { %v937_v5 = vsub.s32 32, %v936_v29  ;;  %v938_v37 = vshll.u32 %v2596_v8, %v936_v29  ;;  %v941_v42 = vsub.s32 4294967266, %v936_v29  ;;  %v824_v25 = vsel %vm817_vm4, %v820_v46, %v823_v0 }
  0xf1   :  { %v2655_v59 = vsel %vm814_vm7, nan, %v824_v25  ;;  %v1028_v8 = vshrl.u32 %v1833_v34, %v2563_v62  ;;  %v1087_v26 = vmul.u32 %v1085_v3, %v1061_v54  ;;  %vm2665_vm12 = vcmp.le.f32.partialorder %v827_v12, 0.7853982 }
  0xf2   :  { %v939_v53 = vshrl.u32 %v921_v41, %v937_v5  ;;  %v942_v18 = vadd.s32 127, %v941_v42  ;;  %v2661_v49 = vmul.f32 %v2655_v59, %v2490_v15  ;;  %v1065_v24 = vmul.u32 %v1063_v44, %v1061_v54 }
  0xf3   :  { %v1091_v1 = vshll.u32 %v2641_v31, 16  ;;  %v952_v62 = vsel %vm829_vm10, %v951_v51, %v2580_v43  ;;  %v1049_v12 = vsel %vm1047_vm0, %v2598_v33, 2102212464  ;;  %v1069_v41 = vshll.u32 %v1066_v2, 16 }
  0xf4   :  { %v940_v6 = vor.u32 %v939_v53, %v938_v37  ;;  %v943_v47 = vshll.u32 %v942_v18, 23  ;;  %1756 = vst [vmem:[%s3216_s1 + $0x5] sm:$0x1] %v2661_v49  ;;  %v1089_v21 = vmul.u32 %v1085_v3, %v1062_v20  ;;  %v1068_v54 = vmul.u32 %v1064_v35, %v1062_v20 }
  0xf5   :  { %v1071_v0 = vshll.u32 %v1067_v52, 16  ;;  %v990_v29 = vmul.f32 %v2490_v15, %v2209_v63  ;;  %v1048_v43 = vsel %vm1044_vm2, %v1028_v8, %v2585_v60  ;;  %v1090_v44 = vmul.u32 %v1086_v61, %v1062_v20 }
  0xf6   :  { %v944_v19 = vor.u32 4788187, %v943_v47  ;;  %v947_v4 = vcvt.s32.f32 %v940_v6  ;;  %v1097_v46 = vadd.s32 %v1091_v1, %v1087_v26  ;;  %vm1073_vm14 = vc.u32 %v1065_v24, %v1069_v41 }
  0xf7   :  { %v1075_v37 = vadd.s32 %v1069_v41, %v1065_v24  ;;  %vm1095_vm13 = vc.u32 %v1087_v26, %v1091_v1  ;;  %1758 = vst [vmem:[%s3216_s1 + $0x4] sm:$0x1] %v990_v29  ;;  %v1050_v33 = vsel %vm1046_vm6, %v2589_v32, %v1049_v12  ;;  %v1070_v3 = vshrl.u32 %v1066_v2, 16 }
  0xf8   :  { %v945_v5 = vand.u32 2147483647, %v944_v19  ;;  %v1074_v35 = vsel %vm1073_vm14, 1, %v1839_v23  ;;  %v1093_v42 = vshll.u32 %v1089_v21, 16  ;;  %v1072_v60 = vshrl.u32 %v1067_v52, 16 }
  0xf9   :  { %v1076_v61 = vadd.s32 %v1074_v35, %v1068_v54  ;;  %vm1077_vm15 = vc.u32 %v1075_v37, %v1071_v0  ;;  %v1092_v51 = vshrl.u32 %v2641_v31, 16  ;;  %v1096_v53 = vsel %vm1095_vm13, 1, %v1839_v23 }
  0xfa   :  { %v948_v25 = vmul.f32 %v947_v4, %v945_v5  ;;  %v1078_v20 = vsel %vm1077_vm15, 1, %v1839_v23  ;;  %vm1099_vm1 = vc.u32 %v1097_v46, %v1093_v42  ;;  %v1098_v26 = vadd.s32 %v1096_v53, %v1090_v44  ;;  %v998_v53 = vld [vmem:[#allocation2 + $0x6] sm:$0x1] }
  0xfb   :  { %v1080_v8 = vadd.s32 %v1078_v20, %v1076_v61  ;;  %v1100_v32 = vsel %vm1099_vm1, 1, %v1839_v23  ;;  %v954_v2 = vsel %vm2665_vm12, 0, %v952_v62  ;;  %v1051_v52 = vsel %vm1045_vm5, %v1048_v43, %v1050_v33 }
  0xfc   :  { %v949_v18 = vxor.u32 2147483648, %v948_v25  ;;  %v1094_v6 = vshrl.u32 %v1089_v21, 16  ;;  %vm1179_vm2 = vcmp.gt.s32.totalorder %v1178_v30, 0  ;;  %v1102_v24 = vadd.s32 %v1100_v32, %v1098_v26 }
  0xfd   :  { %v1081_v31 = vadd.s32 %v1080_v8, %v1070_v3  ;;  %v1180_v1 = vsel %vm1179_vm2, %v1178_v30, 0  ;;  %v2704_v12 = vadd.f32 %v2541_v58, %v2008_v57  ;;  %v2711_v62 = vadd.s32 %v1097_v46, %v1093_v42 }
  0xfe   :  { %v950_v47 = vsel %vm829_vm10, %v949_v18, %v948_v25  ;;  %v1182_v38 = vand.u32 31, %v1180_v1  ;;  %v2714_v21 = vmul.f32 0.020833334, %v2552_v40  ;;  %v1103_v30 = vadd.s32 %v1102_v24, %v1092_v51  ;;  %v1000_v18 = vld [vmem:[#allocation2 + $0x7] sm:$0x1] }
  0xff   :  { %v2709_v41 = vsel %vm2665_vm12, %v2008_v57, %v950_v47  ;;  %v2718_v4 = vadd.s32 %v1081_v31, %v1072_v60  ;;  %v2720_v54 = vand.u32 3, %v954_v2  ;;  %v1105_v0 = vmul.u32 %v2601_v17, %v1051_v52 }
 0x100   :  { %v955_v19 = vmul.f32 %v2709_v41, %v2709_v41  ;;  %v1176_v27 = vor.u32 8388608, %v2651_v11  ;;  %v2724_v29 = vsub.s32 32, %v1182_v38  ;;  %v1104_v46 = vadd.s32 %v1103_v30, %v1094_v6 }
 0x101   :  { %v1185_v40 = vshll.u32 %v1833_v34, %v1182_v38  ;;  %vm1107_vm3 = vc.u32 %v2718_v4, %v2711_v62  ;;  %v1188_v37 = vshll.u32 %v1834_v36, %v1182_v38  ;;  %v2734_v35 = vshrl.u32 %v1180_v1, 5 }
 0x102   :  { %v956_v43 = vmul.f32 -0.001358992, %v955_v19  ;;  %v963_v44 = vmul.f32 -0.00019511016, %v955_v19  ;;  %v1186_v5 = vshrl.u32 %v1834_v36, %v2724_v29  ;;  %v1189_v17 = vshrl.u32 %v1835_v39, %v2724_v29 }
 0x103   :  { %v1108_v3 = vadd.s32 1, %v1104_v46  ;;  %v1191_v42 = vshll.u32 %v1835_v39, %v1182_v38  ;;  %v1192_v25 = vshrl.u32 %v1836_v45, %v2724_v29  ;;  %v1194_v60 = vshll.u32 %v1836_v45, %v1182_v38 }
 0x104   :  { %v957_v33 = vadd.f32 0.041655596, %v956_v43  ;;  %v964_v11 = vadd.f32 0.008332121, %v963_v44  ;;  %v1195_v61 = vshrl.u32 %v1837_v48, %v2724_v29  ;;  %v2745_v26 = vor.u32 %v1186_v5, %v1185_v40 }
 0x105   :  { %v1109_v8 = vsel %vm1107_vm3, %v1108_v3, %v1104_v46  ;;  %vm973_vm0 = vcmp.eq.s32.totalorder %v2720_v54, 0  ;;  %v2748_v2 = vor.u32 %v1189_v17, %v1188_v37  ;;  %v1197_v52 = vshll.u32 %v1837_v48, %v1182_v38 }
 0x106   :  { %v958_v20 = vmul.f32 %v957_v33, %v955_v19  ;;  %v965_v51 = vmul.f32 %v964_v11, %v955_v19  ;;  %v1110_v32 = vadd.s32 %v1109_v8, %v1105_v0  ;;  %v1198_v6 = vshrl.u32 %v1838_v9, %v2724_v29 }
 0x107   :  { %vm972_vm4 = vcmp.lt.s32.totalorder %v2720_v54, 2  ;;  %v1196_v24 = vor.u32 %v1195_v61, %v1194_v60  ;;  %vm1200_vm5 = vcmp.lt.s32.totalorder %v2734_v35, 1  ;;  %v1001_v1 = vadd.f32 %v1000_v18, %v998_v53 }
 0x108   :  { %v959_v47 = vadd.f32 -0.4999988, %v958_v20  ;;  %v966_v31 = vadd.f32 -0.16666654, %v965_v51  ;;  %v1111_v30 = vadd.s32 536870912, %v1110_v32  ;;  %v2755_v43 = vor.u32 %v1192_v25, %v1191_v42 }
 0x109   :  { %v2757_v44 = vshll.u32 %v1176_v27, 8  ;;  %vm1202_vm6 = vcmp.lt.s32.totalorder %v2734_v35, 3  ;;  %vm1203_vm7 = vcmp.lt.s32.totalorder %v2734_v35, 4  ;;  %v1199_v40 = vor.u32 %v1198_v6, %v1197_v52  ;;  %v1003_v27 = vld [vmem:[#allocation2 + $0x9] sm:$0x1] }
 0x10a   :  { %v960_v0 = vmul.f32 %v959_v47, %v955_v19  ;;  %v967_v46 = vmul.f32 %v966_v31, %v955_v19  ;;  %v2761_v38 = vshrl.u32 %v1111_v30, 30  ;;  %vm1201_vm8 = vcmp.lt.s32.totalorder %v2734_v35, 2 }
 0x10b   :  { %v1208_v5 = vsel %vm1200_vm5, %v2745_v26, %v2748_v2  ;;  %vm970_vm9 = vweird.f32 %v2008_v57  ;;  %v1209_v19 = vsel %vm1203_vm7, %v1196_v24, 920167782  ;;  %vm976_vm10 = vcmp.eq.s32.totalorder %v2720_v54, 2 }
 0x10c   :  { %v961_v37 = vadd.f32 1.0, %v960_v0  ;;  %v968_v17 = vadd.f32 1.0, %v967_v46  ;;  %v993_v33 = vadd.f32 %v2497_v16, %v2232_v56  ;;  %v1113_v11 = vshll.u32 %v2761_v38, 30 }
 0x10d   :  { %v1210_v3 = vsel %vm1202_vm6, %v2755_v43, %v1209_v19  ;;  %v1212_v61 = vsel %vm1200_vm5, %v2748_v2, %v2755_v43  ;;  %v1004_v20 = vadd.f32 %v1003_v27, %v1001_v1  ;;  %v1213_v56 = vsel %vm1203_vm7, %v1199_v40, 1326507024  ;;  %v1006_v1 = vld [vmem:[#allocation2 + $0xa] sm:$0x1] }
 0x10e   :  { %v969_v42 = vmul.f32 %v968_v17, %v2709_v41  ;;  %v977_v25 = vxor.u32 2147483648, %v961_v37  ;;  %v1211_v60 = vsel %vm1201_vm8, %v1208_v5, %v1210_v3  ;;  %v2785_v51 = vsub.s32 %v1110_v32, %v1113_v11 }
 0x10f   :  { %v1217_v16 = vand.u32 65535, %v2757_v44  ;;  %v1214_v41 = vsel %vm1202_vm6, %v1196_v24, %v1213_v56  ;;  %v1218_v8 = vshrl.u32 %v2757_v44, 16  ;;  %v1242_v6 = vshrl.u32 %v1211_v60, 16 }
 0x110   :  { %v974_v53 = vxor.u32 2147483648, %v969_v42  ;;  %v978_v18 = vsel %vm976_vm10, %v977_v25, %v969_v42  ;;  %vm1115_vm11 = vcmp.lt.s32.totalorder %v2785_v51, 0  ;;  %v1116_v52 = vsub.s32 0, %v2785_v51 }
 0x111   :  { %v1215_v32 = vsel %vm1201_vm8, %v1212_v61, %v1214_v41  ;;  %v2798_v47 = vmul.f32 0.5, %v2704_v12  ;;  %v994_v46 = vadd.f32 %v993_v33, %v2661_v49  ;;  %v1241_v5 = vand.u32 65535, %v1211_v60 }
 0x112   :  { %v975_v31 = vsel %vm973_vm0, %v961_v37, %v974_v53  ;;  %v1219_v30 = vand.u32 65535, %v1215_v32  ;;  %v1220_v0 = vshrl.u32 %v1215_v32, 16  ;;  %v1117_v40 = vsel %vm1115_vm11, %v1116_v52, %v2785_v51 }
 0x113   :  { %v979_v24 = vsel %vm972_vm4, %v975_v31, %v978_v18  ;;  %v1118_v12 = vclz %v1117_v40  ;;  %v1007_v11 = vadd.f32 %v1006_v1, %v1004_v20  ;;  %v2816_v54 = vmul.u32 %v1242_v6, %v1217_v16 }
 0x114   :  { %v2808_v17 = vsel %vm970_vm9, nan, %v979_v24  ;;  %v1221_v27 = vmul.u32 %v1219_v30, %v1217_v16  ;;  %v1222_v19 = vmul.u32 %v1220_v0, %v1217_v16  ;;  %v2814_v3 = vmul.u32 %v1219_v30, %v1218_v8 }
 0x115   :  { %v2812_v37 = vmul.f32 %v2808_v17, %v2209_v63  ;;  %v1761_v33 = vadd.s32 4294967294, %v1118_v12  ;;  %v1224_v42 = vmul.u32 %v1220_v0, %v1218_v8  ;;  %v1351_v60 = vand.u32 2147483647, %v2798_v47 }
 0x116   :  { %v1225_v25 = vshll.u32 %v1222_v19, 16  ;;  %v1106_v61 = vadd.s32 %v2711_v62, %v2718_v4  ;;  %v1243_v20 = vmul.u32 %v1241_v5, %v1217_v16  ;;  %v1245_v56 = vmul.u32 %v1241_v5, %v1218_v8 }
 0x117   :  { %1757 = vst [vmem:[%s3216_s1 + $0x6] sm:$0x1] %v2812_v37  ;;  %v995_v57 = vadd.f32 %v994_v46, %v2812_v37  ;;  %vm1014_vm12 = vcmp.lt.s32.totalorder %v2465_v10, 0  ;;  %vm1762_vm14 = vcmp.lt.s32.totalorder %v1761_v33, 0  ;;  %v1227_v53 = vshll.u32 %v2814_v3, 16 }
 0x118   :  { %vm1229_vm13 = vc.u32 %v1221_v27, %v1225_v25  ;;  %v1231_v18 = vadd.s32 %v1225_v25, %v1221_v27  ;;  %v1121_v52 = vsel %vm1762_vm14, 0, %v1761_v33  ;;  %v1247_v31 = vshll.u32 %v2816_v54, 16 }
 0x119   :  { %v996_v41 = vmul.f32 4.0, %v995_v57  ;;  %v1230_v32 = vsel %vm1229_vm13, 1, %v1839_v23  ;;  %v1122_v1 = vsub.s32 32, %v1121_v52  ;;  %v1123_v30 = vshll.u32 %v2785_v51, %v1121_v52 }
 0x11a   :  { %v1126_v0 = vsub.s32 4294967266, %v1121_v52  ;;  %v1232_v62 = vadd.s32 %v1230_v32, %v1224_v42  ;;  %v1184_v16 = vshrl.u32 %v1833_v34, %v2724_v29  ;;  %v1205_v24 = vsel %vm1203_vm7, %v2755_v43, 2102212464 }
 0x11b   :  { %v1008_v4 = vsub.f32 %v996_v41, %v1007_v11  ;;  %v1246_v46 = vmul.u32 %v1242_v6, %v1218_v8  ;;  %v1124_v40 = vshrl.u32 %v1106_v61, %v1122_v1  ;;  %v1226_v12 = vshrl.u32 %v1222_v19, 16 }
 0x11c   :  { %v1127_v5 = vadd.s32 127, %v1126_v0  ;;  %vm1233_vm15 = vc.u32 %v1231_v18, %v1227_v53  ;;  %v1136_v51 = vsub.s32 4, %v2761_v38  ;;  %v1249_v11 = vshll.u32 %v1245_v56, 16 }
 0x11d   :  { %v2837_v27 = vmul.f32 %v1008_v4, %v2714_v21  ;;  %v1234_v33 = vsel %vm1233_vm15, 1, %v1839_v23  ;;  %v1125_v42 = vor.u32 %v1124_v40, %v1123_v30  ;;  %vm1251_vm1 = vc.u32 %v1243_v20, %v1247_v31 }
 0x11e   :  { %v1128_v25 = vshll.u32 %v1127_v5, 23  ;;  %v1236_v29 = vadd.s32 %v1234_v33, %v1232_v62  ;;  %v1228_v43 = vshrl.u32 %v2814_v3, 16  ;;  %v1252_v8 = vsel %vm1251_vm1, 1, %v1839_v23 }
 0x11f   :  { %1759 = vst [vmem:[%s3216_s1 + $0x12] sm:$0x1] %v2837_v27  ;;  %v1253_v6 = vadd.s32 %v1247_v31, %v1243_v20  ;;  %v1354_v19 = vand.u32 2139095040, %v2798_v47  ;;  %v1132_v61 = vcvt.s32.f32 %v1125_v42  ;;  %v1254_v18 = vadd.s32 %v1252_v8, %v1246_v46 }
 0x120   :  { %v1129_v57 = vor.u32 4788187, %v1128_v25  ;;  %v1237_v53 = vadd.s32 %v1236_v29, %v1226_v12  ;;  %v1137_v41 = vsel %vm1014_vm12, %v1136_v51, %v2761_v38  ;;  %v1248_v52 = vshrl.u32 %v2816_v54, 16 }
 0x121   :  { %vm1255_vm2 = vc.u32 %v1253_v6, %v1249_v11  ;;  %v1355_v32 = vshrl.u32 %v1354_v19, 23  ;;  %v1204_v3 = vsel %vm1200_vm5, %v1184_v16, %v2745_v26  ;;  %v1206_v20 = vsel %vm1202_vm6, %v2748_v2, %v1205_v24 }
 0x122   :  { %v1130_v1 = vand.u32 2147483647, %v1129_v57  ;;  %v1256_v31 = vsel %vm1255_vm2, 1, %v1839_v23  ;;  %vm2861_vm3 = vcmp.le.f32.partialorder %v1012_v28, 0.7853982  ;;  %v1250_v38 = vshrl.u32 %v1245_v56, 16 }
 0x123   :  { %v1258_v54 = vadd.s32 %v1256_v31, %v1254_v18  ;;  %v1771_v0 = vadd.s32 4294967169, %v1355_v32  ;;  %v1139_v4 = vsel %vm2861_vm3, 0, %v1137_v41  ;;  %v2867_v26 = vadd.s32 %v1237_v53, %v1228_v43 }
 0x124   :  { %v1133_v62 = vmul.f32 %v1132_v61, %v1130_v1  ;;  %v2869_v16 = vadd.s32 %v1253_v6, %v1249_v11  ;;  %v1207_v2 = vsel %vm1201_vm8, %v1204_v3, %v1206_v20  ;;  %v1358_v28 = vand.u32 8388607, %v1351_v60 }
 0x125   :  { %v1259_v24 = vadd.s32 %v1258_v54, %v1248_v52  ;;  %v1361_v46 = vadd.s32 1, %v1771_v0  ;;  %v1156_v56 = vadd.s32 3, %v1139_v4  ;;  %v1261_v51 = vmul.u32 %v2757_v44, %v1207_v2 }
 0x126   :  { %v1134_v40 = vxor.u32 2147483648, %v1133_v62  ;;  %vm1263_vm4 = vc.u32 %v2867_v26, %v2869_v16  ;;  %v1359_v42 = vor.u32 8388608, %v1358_v28  ;;  %v1507_v18 = vand.u32 2147483647, %v2541_v58 }
 0x127   :  { %v1260_v5 = vadd.s32 %v1259_v24, %v1250_v38  ;;  %vm1362_vm0 = vcmp.gt.s32.totalorder %v1361_v46, 0  ;;  %v2883_v43 = vand.u32 3, %v1156_v56  ;;  %v1510_v41 = vand.u32 2139095040, %v2541_v58 }
 0x128   :  { %v1135_v12 = vsel %vm1014_vm12, %v1134_v40, %v1133_v62  ;;  %v1363_v33 = vsel %vm1362_vm0, %v1361_v46, 0  ;;  %v2889_v53 = vshll.u32 %v1359_v42, 8  ;;  %vm1155_vm8 = vweird.f32 %v2465_v10 }
 0x129   :  { %v1138_v35 = vsel %vm2861_vm3, %v2465_v10, %v1135_v12  ;;  %v1264_v11 = vadd.s32 1, %v1260_v5  ;;  %v1365_v25 = vand.u32 31, %v1363_v33  ;;  %v2887_v61 = vshrl.u32 %v1363_v33, 5 }
 0x12a   :  { %v1140_v29 = vmul.f32 %v1138_v35, %v1138_v35  ;;  %vm1162_vm5 = vcmp.eq.s32.totalorder %v2883_v43, 2  ;;  %vm1159_vm6 = vcmp.eq.s32.totalorder %v2883_v43, 0  ;;  %vm1158_vm7 = vcmp.lt.s32.totalorder %v2883_v43, 2 }
 0x12b   :  { %v1265_v8 = vsel %vm1263_vm4, %v1264_v11, %v1260_v5  ;;  %v2885_v6 = vsub.s32 32, %v1365_v25  ;;  %v1371_v3 = vshll.u32 %v1834_v36, %v1365_v25  ;;  %v1374_v31 = vshll.u32 %v1835_v39, %v1365_v25 }
 0x12c   :  { %v1141_v19 = vmul.f32 -0.001358992, %v1140_v29  ;;  %v1148_v57 = vmul.f32 -0.00019511016, %v1140_v29  ;;  %v1266_v44 = vadd.s32 %v1265_v8, %v1261_v51  ;;  %v1377_v38 = vshll.u32 %v1836_v45, %v1365_v25 }
 0x12d   :  { %v1372_v20 = vshrl.u32 %v1835_v39, %v2885_v6  ;;  %v1375_v30 = vshrl.u32 %v1836_v45, %v2885_v6  ;;  %v1378_v4 = vshrl.u32 %v1837_v48, %v2885_v6  ;;  %v1368_v2 = vshll.u32 %v1833_v34, %v1365_v25 }
 0x12e   :  { %v1142_v52 = vadd.f32 0.041655596, %v1141_v19  ;;  %v1149_v32 = vadd.f32 0.008332121, %v1148_v57  ;;  %v1267_v1 = vadd.s32 536870912, %v1266_v44  ;;  %v1369_v24 = vshrl.u32 %v1834_v36, %v2885_v6 }
 0x12f   :  { %v1380_v28 = vshll.u32 %v1837_v48, %v1365_v25  ;;  %v1381_v46 = vshrl.u32 %v1838_v9, %v2885_v6  ;;  %v1511_v12 = vshrl.u32 %v1510_v41, 23  ;;  %v2912_v51 = vor.u32 %v1372_v20, %v1371_v3  ;;  %v2916_v25 = vld [vmem:[#allocation2 + $0x1] sm:$0x1] }
 0x130   :  { %v1143_v54 = vmul.f32 %v1142_v52, %v1140_v29  ;;  %v1150_v0 = vmul.f32 %v1149_v32, %v1140_v29  ;;  %v1268_v62 = vshrl.u32 %v1267_v1, 30  ;;  %v2914_v33 = vor.u32 %v1375_v30, %v1374_v31 }
 0x131   :  { %v1379_v11 = vor.u32 %v1378_v4, %v1377_v38  ;;  %v1382_v42 = vor.u32 %v1381_v46, %v1380_v28  ;;  %vm1170_vm9 = vcmp.lt.s32.totalorder %v2916_v25, 0  ;;  %vm1383_vm10 = vcmp.lt.s32.totalorder %v2887_v61, 1 }
 0x132   :  { %v1144_v40 = vadd.f32 -0.4999988, %v1143_v54  ;;  %v1151_v56 = vadd.f32 -0.16666654, %v1150_v0  ;;  %v1269_v5 = vshll.u32 %v1268_v62, 30  ;;  %v1370_v52 = vor.u32 %v1369_v24, %v1368_v2 }
 0x133   :  { %vm1385_vm11 = vcmp.lt.s32.totalorder %v2887_v61, 3  ;;  %vm1386_vm12 = vcmp.lt.s32.totalorder %v2887_v61, 4  ;;  %v1400_v41 = vand.u32 65535, %v2889_v53  ;;  %vm2925_vm13 = vcmp.le.f32.partialorder %v1168_v14, 0.7853982 }
 0x134   :  { %v1145_v8 = vmul.f32 %v1144_v40, %v1140_v29  ;;  %v1152_v19 = vmul.f32 %v1151_v56, %v1140_v29  ;;  %v1270_v57 = vsub.s32 %v1266_v44, %v1269_v5  ;;  %vm1384_vm15 = vcmp.lt.s32.totalorder %v2887_v61, 2 }
 0x135   :  { %v1392_v44 = vsel %vm1386_vm12, %v1379_v11, 920167782  ;;  %v1395_v20 = vsel %vm1383_vm10, %v2912_v51, %v2914_v33  ;;  %v1396_v31 = vsel %vm1386_vm12, %v1382_v42, 1326507024  ;;  %v1774_v14 = vadd.s32 4294967169, %v1511_v12 }
 0x136   :  { %v1146_v32 = vadd.f32 1.0, %v1145_v8  ;;  %v1153_v1 = vadd.f32 1.0, %v1152_v19  ;;  %vm1271_vm14 = vcmp.lt.s32.totalorder %v1270_v57, 0  ;;  %v1272_v3 = vsub.s32 0, %v1270_v57 }
 0x137   :  { %v1292_v0 = vsub.s32 4, %v1268_v62  ;;  %v1391_v4 = vsel %vm1383_vm10, %v1370_v52, %v2912_v51  ;;  %v1397_v2 = vsel %vm1385_vm11, %v1379_v11, %v1396_v31  ;;  %v1262_v40 = vadd.s32 %v2869_v16, %v2867_v26 }
 0x138   :  { %v1154_v30 = vmul.f32 %v1153_v1, %v1138_v35  ;;  %v1163_v38 = vxor.u32 2147483648, %v1146_v32  ;;  %v1273_v50 = vsel %vm1271_vm14, %v1272_v3, %v1270_v57  ;;  %v1393_v35 = vsel %vm1385_vm11, %v2914_v33, %v1392_v44 }
 0x139   :  { %v1274_v54 = vclz %v1273_v50  ;;  %v1398_v46 = vsel %vm1384_vm15, %v1395_v20, %v1397_v2  ;;  %v1367_v42 = vshrl.u32 %v1833_v34, %v2885_v6  ;;  %v1401_v8 = vshrl.u32 %v2889_v53, 16 }
 0x13a   :  { %v1160_v24 = vxor.u32 2147483648, %v1154_v30  ;;  %v1164_v28 = vsel %vm1162_vm5, %v1163_v38, %v1154_v30  ;;  %v1402_v5 = vand.u32 65535, %v1398_v46  ;;  %v1403_v12 = vshrl.u32 %v1398_v46, 16 }
 0x13b   :  { %v1764_v56 = vadd.s32 4294967294, %v1274_v54  ;;  %v2957_v19 = vadd.s32 1, %v1774_v14  ;;  %v1293_v26 = vsel %vm1170_vm9, %v1292_v0, %v1268_v62  ;;  %v1394_v16 = vsel %vm1384_vm15, %v1391_v4, %v1393_v35 }
 0x13c   :  { %v1161_v11 = vsel %vm1159_vm6, %v1146_v32, %v1160_v24  ;;  %v1404_v6 = vmul.u32 %v1402_v5, %v1400_v41  ;;  %v1405_v44 = vmul.u32 %v1403_v12, %v1400_v41  ;;  %v1295_v62 = vsel %vm2925_vm13, 0, %v1293_v26 }
 0x13d   :  { %v1165_v1 = vsel %vm1158_vm7, %v1161_v11, %v1164_v28  ;;  %vm1765_vm1 = vcmp.lt.s32.totalorder %v1764_v56, 0  ;;  %v1406_v38 = vmul.u32 %v1402_v5, %v1401_v8  ;;  %v1424_v50 = vand.u32 65535, %v1394_v16 }
 0x13e   :  { %v2967_v32 = vsel %vm1155_vm8, nan, %v1165_v1  ;;  %v1277_v3 = vsel %vm1765_vm1, 0, %v1764_v56  ;;  %v1425_v14 = vshrl.u32 %v1394_v16, 16  ;;  %v1407_v0 = vmul.u32 %v1403_v12, %v1401_v8 }
 0x13f   :  { %v2971_v20 = vmul.f32 %v2967_v32, %v2224_v7  ;;  %v1278_v43 = vsub.s32 32, %v1277_v3  ;;  %v1279_v31 = vshll.u32 %v1270_v57, %v1277_v3  ;;  %v1282_v30 = vsub.s32 4294967266, %v1277_v3 }
 0x140   :  { %v1408_v4 = vshll.u32 %v1405_v44, 16  ;;  %v1387_v7 = vsel %vm1383_vm10, %v1367_v42, %v1370_v52  ;;  %v1388_v57 = vsel %vm1386_vm12, %v2914_v33, 2102212464  ;;  %v1409_v2 = vshrl.u32 %v1405_v44, 16 }
 0x141   :  { %v1280_v54 = vshrl.u32 %v1262_v40, %v1278_v43  ;;  %v1283_v10 = vadd.s32 127, %v1282_v30  ;;  %1766 = vst [vmem:[%s3216_s1 + $0x7] sm:$0x1] %v2971_v20  ;;  %v1410_v24 = vshll.u32 %v1406_v38, 16  ;;  %v2986_v40 = vmul.f32 %v2967_v32, %v2808_v17 }
 0x142   :  { %vm1412_vm2 = vc.u32 %v1404_v6, %v1408_v4  ;;  %v1414_v46 = vadd.s32 %v1408_v4, %v1404_v6  ;;  %v1426_v5 = vmul.u32 %v1424_v50, %v1400_v41  ;;  %v1427_v12 = vmul.u32 %v1425_v14, %v1400_v41 }
 0x143   :  { %v1281_v28 = vor.u32 %v1280_v54, %v1279_v31  ;;  %v1284_v35 = vshll.u32 %v1283_v10, 23  ;;  %v1413_v56 = vsel %vm1412_vm2, 1, %v1839_v23  ;;  %1768 = vst [vmem:[%s3216_s1 + $0xa] sm:$0x1] %v2986_v40  ;;  %v1331_v33 = vmul.f32 %v2967_v32, %v2490_v15 }
 0x144   :  { %v1415_v42 = vadd.s32 %v1413_v56, %v1407_v0  ;;  %vm1416_vm3 = vc.u32 %v1414_v46, %v1410_v24  ;;  %v1389_v17 = vsel %vm1385_vm11, %v2912_v51, %v1388_v57  ;;  %v1428_v26 = vmul.u32 %v1424_v50, %v1401_v8 }
 0x145   :  { %v1285_v11 = vor.u32 4788187, %v1284_v35  ;;  %v1288_v52 = vcvt.s32.f32 %v1281_v28  ;;  %v1417_v1 = vsel %vm1416_vm3, 1, %v1839_v23  ;;  %v1429_v3 = vmul.u32 %v1425_v14, %v1401_v8  ;;  %1769 = vst [vmem:[%s3216_s1 + $0x8] sm:$0x1] %v1331_v33 }
 0x146   :  { %v1419_v16 = vadd.s32 %v1417_v1, %v1415_v42  ;;  %v1430_v6 = vshll.u32 %v1427_v12, 16  ;;  %v1411_v44 = vshrl.u32 %v1406_v38, 16  ;;  %v1432_v43 = vshll.u32 %v1428_v26, 16 }
 0x147   :  { %v1286_v41 = vand.u32 2147483647, %v1285_v11  ;;  %v3004_v31 = vand.u32 8388607, %v1507_v18  ;;  %v1312_v10 = vadd.s32 3, %v1295_v62  ;;  %v1390_v50 = vsel %vm1384_vm15, %v1387_v7, %v1389_v17 }
 0x148   :  { %v1420_v54 = vadd.s32 %v1419_v16, %v1409_v2  ;;  %vm1434_vm0 = vc.u32 %v1426_v5, %v1430_v6  ;;  %v1436_v51 = vadd.s32 %v1430_v6, %v1426_v5  ;;  %vm1518_vm4 = vcmp.gt.s32.totalorder %v2957_v19, 0 }
 0x149   :  { %v1289_v30 = vmul.f32 %v1288_v52, %v1286_v41  ;;  %v1435_v8 = vsel %vm1434_vm0, 1, %v1839_v23  ;;  %v1431_v0 = vshrl.u32 %v1427_v12, 16  ;;  %v1519_v2 = vsel %vm1518_vm4, %v2957_v19, 0 }
 0x14a   :  { %v1437_v38 = vadd.s32 %v1435_v8, %v1429_v3  ;;  %vm1438_vm5 = vc.u32 %v1436_v51, %v1432_v43  ;;  %v3010_v4 = vadd.s32 %v1420_v54, %v1411_v44  ;;  %v3013_v24 = vadd.s32 %v1436_v51, %v1432_v43 }
 0x14b   :  { %v1290_v14 = vxor.u32 2147483648, %v1289_v30  ;;  %v1439_v57 = vsel %vm1438_vm5, 1, %v1839_v23  ;;  %v1433_v62 = vshrl.u32 %v1428_v26, 16  ;;  %v1521_v28 = vand.u32 31, %v1519_v2 }
 0x14c   :  { %v1441_v7 = vadd.s32 %v1439_v57, %v1437_v38  ;;  %v3021_v46 = vand.u32 3, %v1312_v10  ;;  %v1444_v56 = vmul.u32 %v2889_v53, %v1390_v50  ;;  %v1515_v5 = vor.u32 8388608, %v3004_v31 }
 0x14d   :  { %v1291_v61 = vsel %vm1170_vm9, %v1290_v14, %v1289_v30  ;;  %v3025_v52 = vshrl.u32 %v1519_v2, 5  ;;  %v3027_v19 = vsub.s32 32, %v1521_v28  ;;  %vm1446_vm6 = vc.u32 %v3010_v4, %v3013_v24  ;;  %v1338_v14 = vld [vmem:[#allocation2 + $0x7] sm:$0x1] }
 0x14e   :  { %v1294_v35 = vsel %vm2925_vm13, %v2916_v25, %v1291_v61  ;;  %v1442_v11 = vadd.s32 %v1441_v7, %v1431_v0  ;;  %v1524_v42 = vshll.u32 %v1833_v34, %v1521_v28  ;;  %v1527_v29 = vshll.u32 %v1834_v36, %v1521_v28  ;;  %v1340_v0 = vld [vmem:[#allocation2 + $0x8] sm:$0x1] }
 0x14f   :  { %v1296_v12 = vmul.f32 %v1294_v35, %v1294_v35  ;;  %v1533_v33 = vshll.u32 %v1836_v45, %v1521_v28  ;;  %v1530_v26 = vshll.u32 %v1835_v39, %v1521_v28  ;;  %v1525_v41 = vshrl.u32 %v1834_v36, %v3027_v19 }
 0x150   :  { %v1443_v53 = vadd.s32 %v1442_v11, %v1433_v62  ;;  %v1528_v16 = vshrl.u32 %v1835_v39, %v3027_v19  ;;  %v1531_v3 = vshrl.u32 %v1836_v45, %v3027_v19  ;;  %v1534_v6 = vshrl.u32 %v1837_v48, %v3027_v19 }
 0x151   :  { %v1297_v17 = vmul.f32 -0.001358992, %v1296_v12  ;;  %v1304_v1 = vmul.f32 -0.00019511016, %v1296_v12  ;;  %v1536_v30 = vshll.u32 %v1837_v48, %v1521_v28  ;;  %v3044_v54 = vor.u32 %v1525_v41, %v1524_v42 }
 0x152   :  { %v1447_v31 = vadd.s32 1, %v1443_v53  ;;  %v3046_v51 = vor.u32 %v1528_v16, %v1527_v29  ;;  %v1535_v10 = vor.u32 %v1534_v6, %v1533_v33  ;;  %v1537_v36 = vshrl.u32 %v1838_v9, %v3027_v19 }
 0x153   :  { %v1298_v44 = vadd.f32 0.041655596, %v1297_v17  ;;  %v1305_v43 = vadd.f32 0.008332121, %v1304_v1  ;;  %v3053_v8 = vor.u32 %v1531_v3, %v1530_v26  ;;  %vm1539_vm7 = vcmp.lt.s32.totalorder %v3025_v52, 1 }
 0x154   :  { %v1448_v45 = vsel %vm1446_vm6, %v1447_v31, %v1443_v53  ;;  %vm1541_vm8 = vcmp.lt.s32.totalorder %v3025_v52, 3  ;;  %vm1542_vm9 = vcmp.lt.s32.totalorder %v3025_v52, 4  ;;  %v1538_v2 = vor.u32 %v1537_v36, %v1536_v30 }
 0x155   :  { %v1299_v39 = vmul.f32 %v1298_v44, %v1296_v12  ;;  %v1306_v50 = vmul.f32 %v1305_v43, %v1296_v12  ;;  %v1449_v38 = vadd.s32 %v1448_v45, %v1444_v56  ;;  %vm1540_vm10 = vcmp.lt.s32.totalorder %v3025_v52, 2 }
 0x156   :  { %v1548_v61 = vsel %vm1542_vm9, %v1535_v10, 920167782  ;;  %v1547_v28 = vsel %vm1539_vm7, %v3044_v54, %v3046_v51  ;;  %vm1314_vm11 = vcmp.lt.s32.totalorder %v3021_v46, 2  ;;  %v1341_v11 = vadd.f32 %v1340_v0, %v1338_v14 }
 0x157   :  { %v1300_v48 = vadd.f32 -0.4999988, %v1299_v39  ;;  %v1307_v57 = vadd.f32 -0.16666654, %v1306_v50  ;;  %v1450_v9 = vadd.s32 536870912, %v1449_v38  ;;  %v1549_v56 = vsel %vm1541_vm8, %v3053_v8, %v1548_v61 }
 0x158   :  { %v3071_v29 = vshll.u32 %v1515_v5, 8  ;;  %vm1315_vm12 = vcmp.eq.s32.totalorder %v3021_v46, 0  ;;  %v1551_v1 = vsel %vm1539_vm7, %v3046_v51, %v3053_v8  ;;  %vm1318_vm14 = vcmp.eq.s32.totalorder %v3021_v46, 2 }
 0x159   :  { %v1301_v62 = vmul.f32 %v1300_v48, %v1296_v12  ;;  %v1308_v7 = vmul.f32 %v1307_v57, %v1296_v12  ;;  %v3069_v42 = vshrl.u32 %v1450_v9, 30  ;;  %v1342_v12 = vld [vmem:[#allocation2 + $0xa] sm:$0x1]  ;;  %v1550_v26 = vsel %vm1540_vm10, %v1547_v28, %v1549_v56 }
 0x15a   :  { %v1552_v5 = vsel %vm1542_vm9, %v1538_v2, 1326507024  ;;  %v1557_v6 = vshrl.u32 %v3071_v29, 16  ;;  %v1343_v44 = vadd.f32 %v1342_v12, %v1341_v11  ;;  %v1556_v30 = vand.u32 65535, %v3071_v29 }
 0x15b   :  { %v1302_v33 = vadd.f32 1.0, %v1301_v62  ;;  %v1309_v17 = vadd.f32 1.0, %v1308_v7  ;;  %v1452_v53 = vshll.u32 %v3069_v42, 30  ;;  %v1553_v3 = vsel %vm1541_vm8, %v1535_v10, %v1552_v5 }
 0x15c   :  { %v1554_v31 = vsel %vm1540_vm10, %v1551_v1, %v1553_v3  ;;  %v1581_v45 = vshrl.u32 %v1550_v26, 16  ;;  %vm1311_vm13 = vweird.f32 %v2916_v25  ;;  %v1580_v57 = vand.u32 65535, %v1550_v26 }
 0x15d   :  { %v1310_v41 = vmul.f32 %v1309_v17, %v1294_v35  ;;  %v1319_v16 = vxor.u32 2147483648, %v1302_v33  ;;  %v1453_v43 = vsub.s32 %v1449_v38, %v1452_v53  ;;  %v1558_v50 = vand.u32 65535, %v1554_v31  ;;  %v1345_v35 = vld [vmem:[#allocation2 + $0xb] sm:$0x1] }
 0x15e   :  { %v1559_v0 = vshrl.u32 %v1554_v31, 16  ;;  %v1334_v38 = vadd.f32 %v2971_v20, %v2661_v49  ;;  %v1346_v7 = vadd.f32 %v1345_v35, %v1343_v44  ;;  %v1583_v56 = vmul.u32 %v1581_v45, %v1556_v30 }
 0x15f   :  { %v1316_v36 = vxor.u32 2147483648, %v1310_v41  ;;  %v1320_v39 = vsel %vm1318_vm14, %v1319_v16, %v1310_v41  ;;  %vm1454_vm15 = vcmp.lt.s32.totalorder %v1453_v43, 0  ;;  %v1455_v14 = vsub.s32 0, %v1453_v43 }
 0x160   :  { %v3095_v48 = vmul.u32 %v1558_v50, %v1557_v6  ;;  %v1560_v61 = vmul.u32 %v1558_v50, %v1556_v30  ;;  %v1561_v62 = vmul.u32 %v1559_v0, %v1556_v30  ;;  %v1445_v20 = vadd.s32 %v3013_v24, %v3010_v4 }
 0x161   :  { %v1317_v10 = vsel %vm1315_vm12, %v1302_v33, %v1316_v36  ;;  %v1456_v2 = vsel %vm1454_vm15, %v1455_v14, %v1453_v43  ;;  %v1563_v33 = vmul.u32 %v1559_v0, %v1557_v6  ;;  %v1523_v12 = vshrl.u32 %v1833_v34, %v3027_v19 }
 0x162   :  { %v1321_v9 = vsel %vm1314_vm11, %v1317_v10, %v1320_v39  ;;  %v1457_v28 = vclz %v1456_v2  ;;  %v1564_v17 = vshll.u32 %v1561_v62, 16  ;;  %v1566_v49 = vshll.u32 %v3095_v48, 16 }
 0x163   :  { %v3099_v25 = vsel %vm1311_vm13, nan, %v1321_v9  ;;  %v1582_v1 = vmul.u32 %v1580_v57, %v1556_v30  ;;  %v1565_v5 = vshrl.u32 %v1561_v62, 16  ;;  %v1586_v16 = vshll.u32 %v1583_v56, 16 }
 0x164   :  { %v1323_v11 = vmul.f32 %v3099_v25, %v2490_v15  ;;  %v1772_v46 = vadd.s32 4294967294, %v1457_v28  ;;  %vm1568_vm1 = vc.u32 %v1560_v61, %v1564_v17  ;;  %v1570_v26 = vadd.s32 %v1564_v17, %v1560_v61 }
 0x165   :  { %v1584_v15 = vmul.u32 %v1580_v57, %v1557_v6  ;;  %v1569_v41 = vsel %vm1568_vm1, 1, %v1839_v23  ;;  %v1585_v31 = vmul.u32 %v1581_v45, %v1557_v6  ;;  %v1544_v36 = vsel %vm1542_vm9, %v3053_v8, 2102212464 }
 0x166   :  { %1767 = vst [vmem:[%s3216_s1 + $0x9] sm:$0x1] %v1323_v11  ;;  %v1335_v53 = vadd.f32 %v1334_v38, %v1323_v11  ;;  %vm1773_vm2 = vcmp.lt.s32.totalorder %v1772_v46, 0  ;;  %v1571_v3 = vadd.s32 %v1569_v41, %v1563_v33  ;;  %vm1572_vm3 = vc.u32 %v1570_v26, %v1566_v49 }
 0x167   :  { %v1460_v24 = vsel %vm1773_vm2, 0, %v1772_v46  ;;  %v1573_v39 = vsel %vm1572_vm3, 1, %v1839_v23  ;;  %v1588_v50 = vshll.u32 %v1584_v15, 16  ;;  %vm1590_vm0 = vc.u32 %v1582_v1, %v1586_v16 }
 0x168   :  { %v1336_v4 = vadd.f32 %v1335_v53, %v2986_v40  ;;  %v1461_v34 = vsub.s32 32, %v1460_v24  ;;  %v1462_v19 = vshll.u32 %v1453_v43, %v1460_v24  ;;  %v1465_v44 = vsub.s32 4294967266, %v1460_v24 }
 0x169   :  { %v1575_v0 = vadd.s32 %v1573_v39, %v1571_v3  ;;  %v1567_v38 = vshrl.u32 %v3095_v48, 16  ;;  %v1591_v57 = vsel %vm1590_vm0, 1, %v1839_v23  ;;  %v1592_v43 = vadd.s32 %v1586_v16, %v1582_v1 }
 0x16a   :  { %v1337_v30 = vmul.f32 4.0, %v1336_v4  ;;  %v1463_v35 = vshrl.u32 %v1445_v20, %v1461_v34  ;;  %v1466_v14 = vadd.s32 127, %v1465_v44  ;;  %v1593_v2 = vadd.s32 %v1591_v57, %v1585_v31 }
 0x16b   :  { %v1576_v45 = vadd.s32 %v1575_v0, %v1565_v5  ;;  %v1543_v8 = vsel %vm1539_vm7, %v1523_v12, %v3044_v54  ;;  %v1587_v62 = vshrl.u32 %v1583_v56, 16  ;;  %vm1594_vm4 = vc.u32 %v1592_v43, %v1588_v50 }
 0x16c   :  { %v1347_v10 = vsub.f32 %v1337_v30, %v1346_v7  ;;  %v1464_v9 = vor.u32 %v1463_v35, %v1462_v19  ;;  %v1467_v6 = vshll.u32 %v1466_v14, 23  ;;  %v1545_v48 = vsel %vm1541_vm8, %v3046_v51, %v1544_v36 }
 0x16d   :  { %v1595_v11 = vsel %vm1594_vm4, 1, %v1839_v23  ;;  %v1589_v33 = vshrl.u32 %v1584_v15, 16  ;;  %v1577_v20 = vadd.s32 %v1576_v45, %v1567_v38  ;;  %v1596_v54 = vadd.s32 %v1592_v43, %v1588_v50 }
 0x16e   :  { %v3120_v61 = vmul.f32 %v1347_v10, %v2714_v21  ;;  %v1468_v28 = vor.u32 4788187, %v1467_v6  ;;  %v1471_v7 = vcvt.s32.f32 %v1464_v9  ;;  %v1597_v17 = vadd.s32 %v1595_v11, %v1593_v2 }
 0x16f   :  { %v1546_v56 = vsel %vm1540_vm10, %v1543_v8, %v1545_v48  ;;  %vm1353_vm5 = vcmp.lt.s32.totalorder %v2798_v47, 0  ;;  %vm3138_vm6 = vcmp.le.f32.partialorder %v1351_v60, 0.7853982  ;;  %vm1602_vm7 = vc.u32 %v1577_v20, %v1596_v54 }
 0x170   :  { %1770 = vst [vmem:[%s3216_s1 + $0x13] sm:$0x1] %v3120_v61  ;;  %v1469_v49 = vand.u32 2147483647, %v1468_v28  ;;  %v1598_v46 = vadd.s32 %v1597_v17, %v1587_v62  ;;  %v1600_v53 = vmul.u32 %v3071_v29, %v1546_v56  ;;  %v1475_v15 = vsub.s32 4, %v3069_v42 }
 0x171   :  { %vm1494_vm12 = vweird.f32 %v2798_v47  ;;  %vm3176_vm15 = vcmp.le.f32.partialorder %v1507_v18, 0.7853982 }
 0x172   :  { %v1472_v12 = vmul.f32 %v1471_v7, %v1469_v49  ;;  %v1599_v51 = vadd.s32 %v1598_v46, %v1589_v33  ;;  %v1476_v29 = vsel %vm1353_vm5, %v1475_v15, %v3069_v42  ;;  %v1601_v7 = vadd.s32 %v1596_v54, %v1577_v20  ;;  %v1803_v15 = vld [vmem:[#allocation2 + $0x3] sm:$0x1] }
 0x173   :  { %v1478_v31 = vsel %vm3138_vm6, 0, %v1476_v29  ;;  %vm1509_vm13 = vcmp.lt.s32.totalorder %v1803_v15, 0  ;;  %vm1650_vm0 = vweird.f32 %v1803_v15 }
 0x174   :  { %v1473_v1 = vxor.u32 2147483648, %v1472_v12  ;;  %v1603_v26 = vadd.s32 1, %v1599_v51  ;;  %v1495_v0 = vand.u32 3, %v1478_v31 }
 0x176   :  { %v1474_v52 = vsel %vm1353_vm5, %v1473_v1, %v1472_v12  ;;  %v1604_v41 = vsel %vm1602_vm7, %v1603_v26, %v1599_v51  ;;  %vm1500_vm9 = vcmp.eq.s32.totalorder %v1495_v0, 2  ;;  %vm1497_vm10 = vcmp.eq.s32.totalorder %v1495_v0, 0 }
 0x177   :  { %v1477_v5 = vsel %vm3138_vm6, %v2798_v47, %v1474_v52  ;;  %v1605_v60 = vadd.s32 %v1604_v41, %v1600_v53  ;;  %vm1496_vm11 = vcmp.lt.s32.totalorder %v1495_v0, 2  ;;  %v1675_v0 = vld [vmem:[#allocation2 + $0x9] sm:$0x1] }
 0x178   :  { %v1479_v16 = vmul.f32 %v1477_v5, %v1477_v5 }
 0x179   :  { %v1606_v3 = vadd.s32 536870912, %v1605_v60 }
 0x17a   :  { %v1480_v4 = vmul.f32 -0.001358992, %v1479_v16  ;;  %v1487_v24 = vmul.f32 -0.00019511016, %v1479_v16 }
 0x17b   :  { %v3152_v44 = vshrl.u32 %v1606_v3, 30 }
 0x17c   :  { %v1481_v34 = vadd.f32 0.041655596, %v1480_v4  ;;  %v1488_v19 = vadd.f32 0.008332121, %v1487_v24 }
 0x17d   :  { %v1608_v39 = vshll.u32 %v3152_v44, 30 }
 0x17e   :  { %v1482_v30 = vmul.f32 %v1481_v34, %v1479_v16  ;;  %v1489_v36 = vmul.f32 %v1488_v19, %v1479_v16 }
 0x17f   :  { %v1609_v14 = vsub.s32 %v1605_v60, %v1608_v39 }
 0x180   :  { %v1483_v50 = vadd.f32 -0.4999988, %v1482_v30  ;;  %v1490_v35 = vadd.f32 -0.16666654, %v1489_v36 }
 0x181   :  { %vm1610_vm8 = vcmp.lt.s32.totalorder %v1609_v14, 0  ;;  %v1611_v57 = vsub.s32 0, %v1609_v14 }
 0x182   :  { %v1484_v10 = vmul.f32 %v1483_v50, %v1479_v16  ;;  %v1491_v38 = vmul.f32 %v1490_v35, %v1479_v16  ;;  %v1631_v16 = vsub.s32 4, %v3152_v44 }
 0x183   :  { %v1612_v9 = vsel %vm1610_vm8, %v1611_v57, %v1609_v14 }
 0x184   :  { %v1485_v42 = vadd.f32 1.0, %v1484_v10  ;;  %v1492_v43 = vadd.f32 1.0, %v1491_v38  ;;  %v1613_v6 = vclz %v1612_v9  ;;  %v1632_v18 = vsel %vm1509_vm13, %v1631_v16, %v3152_v44  ;;  %v1676_v10 = vld [vmem:[#allocation2 + $0xa] sm:$0x1]  ;;  %v32_v16 = vld [vmem:[#allocation2 + $0x4] sm:$0x1] }
 0x185   :  { %v1634_v19 = vsel %vm3176_vm15, 0, %v1632_v18 }
 0x186   :  { %v1493_v45 = vmul.f32 %v1492_v43, %v1477_v5  ;;  %v1501_v2 = vxor.u32 2147483648, %v1485_v42  ;;  %v1775_v8 = vadd.s32 4294967294, %v1613_v6  ;;  %v1651_v50 = vand.u32 3, %v1634_v19  ;;  %v1702_v43 = vld [vmem:[#allocation2 + $0xb] sm:$0x1] }
 0x188   :  { %v1498_v62 = vxor.u32 2147483648, %v1493_v45  ;;  %v1502_v28 = vsel %vm1500_vm9, %v1501_v2, %v1493_v45  ;;  %vm1776_vm14 = vcmp.lt.s32.totalorder %v1775_v8, 0  ;;  %vm1656_vm1 = vcmp.eq.s32.totalorder %v1651_v50, 2 }
 0x189   :  { %v1616_v11 = vsel %vm1776_vm14, 0, %v1775_v8  ;;  %vm1653_vm2 = vcmp.eq.s32.totalorder %v1651_v50, 0  ;;  %v1677_v45 = vadd.f32 %v1676_v10, %v1675_v0  ;;  %vm1652_vm3 = vcmp.lt.s32.totalorder %v1651_v50, 2 }
 0x18a   :  { %v1499_v48 = vsel %vm1497_vm10, %v1485_v42, %v1498_v62  ;;  %v1617_v17 = vsub.s32 32, %v1616_v11  ;;  %v1618_v49 = vshll.u32 %v1609_v14, %v1616_v11  ;;  %v1621_v56 = vsub.s32 4294967266, %v1616_v11  ;;  %v1701_v42 = vld [vmem:[#allocation2 + $0xa] sm:$0x1] }
 0x18b   :  { %v1503_v33 = vsel %vm1496_vm11, %v1499_v48, %v1502_v28  ;;  %v1703_v8 = vadd.f32 %v1702_v43, %v1701_v42  ;;  %v1704_v48 = vld [vmem:[#allocation2 + $0xd] sm:$0x1] }
 0x18c   :  { %v1504_v46 = vsel %vm1494_vm12, nan, %v1503_v33  ;;  %v1619_v51 = vshrl.u32 %v1601_v7, %v1617_v17  ;;  %v1622_v23 = vadd.s32 127, %v1621_v56  ;;  %v1679_v7 = vld [vmem:[#allocation2 + $0xc] sm:$0x1] }
 0x18d   :  { %v1505_v12 = vmul.f32 %v1504_v46, %v2472_v13  ;;  %v1506_v1 = vmul.f32 %v1504_v46, %v2655_v59  ;;  %v1688_v47 = vmul.f32 %v1504_v46, %v3099_v25  ;;  %v1668_v13 = vmul.f32 %v1504_v46, %v2209_v63 }
 0x18e   :  { %v1620_v53 = vor.u32 %v1619_v51, %v1618_v49  ;;  %v1623_v26 = vshll.u32 %v1622_v23, 23  ;;  %v1694_v4 = vmul.f32 %v1504_v46, %v2967_v32  ;;  %v1680_v49 = vadd.f32 %v1679_v7, %v1677_v45  ;;  %v1682_v23 = vld [vmem:[#allocation2 + $0xd] sm:$0x1] }
 0x18f   :  { %1777 = vst [vmem:[%s3216_s1 + $0xb] sm:$0x1] %v1505_v12  ;;  %v1671_v6 = vadd.f32 %v1505_v12, %v2812_v37  ;;  %v1697_v2 = vadd.f32 %v1506_v1, %v2986_v40  ;;  %v1705_v46 = vadd.f32 %v1704_v48, %v1703_v8  ;;  %v1707_v37 = vld [vmem:[#allocation2 + $0xe] sm:$0x1] }
 0x190   :  { %1778 = vst [vmem:[%s3216_s1 + $0xd] sm:$0x1] %v1506_v1  ;;  %v1624_v20 = vor.u32 4788187, %v1623_v26  ;;  %v1627_v54 = vcvt.s32.f32 %v1620_v53  ;;  %v1683_v26 = vadd.f32 %v1682_v23, %v1680_v49 }
 0x191   :  { %1782 = vst [vmem:[%s3216_s1 + $0x10] sm:$0x1] %v1688_v47  ;;  %v1672_v33 = vadd.f32 %v1671_v6, %v1506_v1  ;;  %v1698_v56 = vadd.f32 %v1697_v2, %v1688_v47 }
 0x192   :  { %v1625_v59 = vand.u32 2147483647, %v1624_v20  ;;  %1780 = vst [vmem:[%s3216_s1 + $0xc] sm:$0x1] %v1668_v13  ;;  %v1715_v13 = vand.u32 2147483647, %v2539_v22 }
 0x193   :  { %1784 = vst [vmem:[%s3216_s1 + $0xf] sm:$0x1] %v1694_v4 }
 0x194   :  { %v1628_v52 = vmul.f32 %v1627_v54, %v1625_v59  ;;  %v1708_v54 = vadd.f32 %v1707_v37, %v1705_v46 }
 0x196   :  { %v1629_v5 = vxor.u32 2147483648, %v1628_v52 }
 0x198   :  { %v1630_v41 = vsel %vm1509_vm13, %v1629_v5, %v1628_v52  ;;  %v1711_v52 = vadd.f32 %v3120_v61, %v2837_v27 }
 0x199   :  { %v1633_v60 = vsel %vm3176_vm15, %v1803_v15, %v1630_v41 }
 0x19a   :  { %v1635_v24 = vmul.f32 %v1633_v60, %v1633_v60 }
 0x19c   :  { %v1636_v3 = vmul.f32 -0.001358992, %v1635_v24  ;;  %v1643_v58 = vmul.f32 -0.00019511016, %v1635_v24 }
 0x19e   :  { %v1637_v29 = vadd.f32 0.041655596, %v1636_v3  ;;  %v1644_v34 = vadd.f32 0.008332121, %v1643_v58 }
 0x1a0   :  { %v1638_v31 = vmul.f32 %v1637_v29, %v1635_v24  ;;  %v1645_v30 = vmul.f32 %v1644_v34, %v1635_v24 }
 0x1a2   :  { %v1639_v36 = vadd.f32 -0.4999988, %v1638_v31  ;;  %v1646_v39 = vadd.f32 -0.16666654, %v1645_v30 }
 0x1a4   :  { %v1640_v35 = vmul.f32 %v1639_v36, %v1635_v24  ;;  %v1647_v14 = vmul.f32 %v1646_v39, %v1635_v24  ;;  %v1721_v24 = vmul.f32 15.0, %v32_v16 }
 0x1a6   :  { %v1641_v38 = vadd.f32 1.0, %v1640_v35  ;;  %v1648_v57 = vadd.f32 1.0, %v1647_v14 }
 0x1a8   :  { %v1649_v44 = vmul.f32 %v1648_v57, %v1633_v60  ;;  %v1657_v9 = vxor.u32 2147483648, %v1641_v38  ;;  %v34_v60 = vld [vmem:[#allocation2 + $0x5] sm:$0x1] }
 0x1aa   :  { %v1654_v62 = vxor.u32 2147483648, %v1649_v44  ;;  %v1658_v28 = vsel %vm1656_vm1, %v1657_v9, %v1649_v44 }
 0x1ac   :  { %v1655_v11 = vsel %vm1653_vm2, %v1641_v38, %v1654_v62 }
 0x1ad   :  { %v1659_v17 = vsel %vm1652_vm3, %v1655_v11, %v1658_v28 }
 0x1ae   :  { %v1660_v51 = vsel %vm1650_vm0, nan, %v1659_v17 }
 0x1af   :  { %v1661_v12 = vmul.f32 %v1660_v51, %v2209_v63  ;;  %v1689_v40 = vmul.f32 %v1660_v51, %v2967_v32  ;;  %v1716_v63 = vand.u32 2147483647, %v2544_v55 }
 0x1b1   :  { %1779 = vst [vmem:[%s3216_s1 + $0xe] sm:$0x1] %v1661_v12  ;;  %v1673_v53 = vadd.f32 %v1672_v33, %v1661_v12  ;;  %v1699_v20 = vadd.f32 %v1698_v56, %v1689_v40  ;;  %v1717_v5 = vmin.f32 %v1715_v13, %v1716_v63 }
 0x1b2   :  { %1783 = vst [vmem:[%s3216_s1 + $0x11] sm:$0x1] %v1689_v40 }
 0x1b3   :  { %v1674_v1 = vmul.f32 4.0, %v1673_v53  ;;  %v1700_v47 = vmul.f32 4.0, %v1699_v20  ;;  %v1718_v4 = vmul.f32 0.25, %v1717_v5 }
 0x1b5   :  { %v1684_v59 = vsub.f32 %v1674_v1, %v1683_v26  ;;  %v1709_v32 = vsub.f32 %v1700_v47, %v1708_v54  ;;  %vm1719_vm4 = vcmp.lt.f32.partialorder %v1718_v4, 1.597858e-06 }
 0x1b7   :  { %v1685_v15 = vmul.f32 %v1684_v59, %v2714_v21  ;;  %v1710_v25 = vmul.f32 %v1709_v32, %v2714_v21  ;;  %v1840_v21 = vmov 0.0  }
 0x1b9   :  { %1781 = vst [vmem:[%s3216_s1 + $0x14] sm:$0x1] %v1685_v15  ;;  %v1712_v41 = vadd.f32 %v1711_v52, %v1685_v15 }
 0x1bb   :  { %v1713_v22 = vadd.f32 %v1712_v41, %v1710_v25 }
 0x1bd   :  { %v1714_v55 = vsub.f32 %v1713_v22, %v34_v60 }
 0x1bf   :  { %v1720_v3 = vand.u32 2147483647, %v1714_v55  ;;  %v1724_v58 = vmul.f32 0.06666667, %v1714_v55 }
 0x1c1   :  { %vm1722_vm5 = vcmp.le.f32.partialorder %v1720_v3, %v1721_v24  ;;  %v1725_v27 = vadd.f32 %v1724_v58, %v1713_v22 }
 0x1c2   :  { %vm1723_vm6 = vmor %vm1722_vm5, %vm1719_vm4 }
 0x1c3   :  { %1726 = vst [vmem:[%s3216_s1] sm:$0x1] %v1725_v27  ;;  %v1785_v61 = vsel %vm1723_vm6, 1.0, %v1840_v21 }
 0x1c4   :  { %1786 = vst [vmem:[%s3216_s1 + $0x1] sm:$0x1] %v1785_v61 }
 0x1c5   :  { %1735 = vsyncpa [#allocation3], 1 }

</bundles_post_ra>
